<compile_context>
chip_gen: v7x
topology: tpu7x:2x2x1
jax: 0.10.0
libtpu: 0.0.40
codegen_flags: <defaults>
</compile_context>

<pallas_src>
import jax
import jax.numpy as jnp
import numpy as np
from jax.experimental import pallas as pl
from jax.experimental.pallas import tpu as pltpu

EMBED = 32          # paras.embed_size
TARGET_NUM = 10     # target_num
BATCH = 2
SEQ = 8
BN_EPS = 1e-5


def seq_embed_kernel(preact_ref, w_hh_ref, w1_ref, b1_ref,
                     w2_ref, b2_ref, w3_ref, b3_ref, out_ref):
    S, B, G = preact_ref.shape          # G = 4H = 128 (exactly one vreg lane width)
    H = G // 4

    w_hh = w_hh_ref[...]                # hoist the recurrent weight load out of the loop

    def step(t, carry):
        h, c = carry                    # (B, G), vreg-resident loop carry
        gates = preact_ref[t] + jnp.dot(h, w_hh, preferred_element_type=jnp.float32)
        sig = jax.nn.sigmoid(gates)     # [ i | f | . | o ]   one full-vreg EUP pass
        th = jnp.tanh(gates)            # [ . | . | g | . ]   one full-vreg EUP pass
        f_g = pltpu.roll(sig, 3 * H, axis=1)   # f -> lanes [0, H)
        g_g = pltpu.roll(th, 2 * H, axis=1)    # g -> lanes [0, H)
        o_g = pltpu.roll(sig, H, axis=1)       # o -> lanes [0, H)
        c_new = f_g * c + sig * g_g     # only lanes [0, H) meaningful (i is already aligned)
        h_new = o_g * jnp.tanh(c_new)   # junk lanes [H, G) are bounded; zero-padded rows of
        return h_new, c_new             # W_hh / W1 make them contribute nothing

    zeros = jnp.zeros((B, G), jnp.float32)     # PyTorch default (h0, c0) = 0
    h_t, _ = jax.lax.fori_loop(0, S, step, (zeros, zeros), unroll=True)

    # decode MLP; eval-mode BatchNorm already folded into w2/b2 and w3/b3
    out = jnp.maximum(
        jnp.dot(h_t, w1_ref[...], preferred_element_type=jnp.float32) + b1_ref[...], 0.0)
    out = jnp.maximum(
        jnp.dot(out, w2_ref[...], preferred_element_type=jnp.float32) + b2_ref[...], 0.0)
    out = jnp.maximum(
        jnp.dot(out, w3_ref[...], preferred_element_type=jnp.float32) + b3_ref[...], 0.0)

    # F.log_softmax(out, dim=1)
    m = jnp.max(out, axis=1, keepdims=True)
    z = out - m
    out_ref[...] = z - jnp.log(jnp.sum(jnp.exp(z), axis=1, keepdims=True))


def fold_params(p):
    """Fold eval-mode BN into the Linears and zero-pad the H-row weights to 4H rows."""
    E, G = EMBED, 4 * EMBED
    w_hh_pad = jnp.zeros((G, G), jnp.float32).at[:E, :].set(p["w_hh"])
    w1_pad = jnp.zeros((G, 4 * E), jnp.float32).at[:E, :].set(p["w1"])
    w2f = p["w2"] * p["bn1_s"]
    b2f = p["b2"] * p["bn1_s"] + p["bn1_b"]
    w3f = p["w3"] * p["bn2_s"]
    b3f = p["b3"] * p["bn2_s"] + p["bn2_b"]
    return w_hh_pad, w1_pad, p["b1"], w2f, b2f, w3f, b3f


def seq_embed_target(labels, p):
    """labels: (B, S) int32 class ids in [0, target_num). Returns (B, K) float32 log-probs."""
    B, S = labels.shape
    E, K = EMBED, p["w3"].shape[1]
    G = 4 * E

    # one_hot(labels) @ W_ih + (b_ih + b_hh)  ==  gather of W_ih rows  (glue, plain JAX)
    preact = jnp.take(p["w_ih"], labels, axis=0) + p["b_lstm"]          # (B, S, 4H)
    preact = jnp.transpose(preact, (1, 0, 2)).astype(jnp.float32)       # (S, B, 4H)

    w_hh_pad, w1_pad, b1, w2f, b2f, w3f, b3f = fold_params(p)

    vmem = pl.BlockSpec(memory_space=pltpu.MemorySpace.VMEM)
    cost = pl.CostEstimate(
        flops=2 * B * (S * G * G + G * G + G * 20 * E + 20 * E * K),
        transcendentals=3 * B * G * S + B * K,
        bytes_accessed=4 * (S * B * G + 2 * G * G + G + G * 20 * E + 20 * E
                            + 20 * E * K + K + B * K))

    return pl.pallas_call(
        seq_embed_kernel,
        out_shape=jax.ShapeDtypeStruct((B, K), jnp.float32),
        in_specs=[vmem] * 8,
        out_specs=vmem,
        cost_estimate=cost,
    )(preact, w_hh_pad, w1_pad, b1, w2f, b2f, w3f, b3f)


def init_params(key):
    """Deterministic synthetic parameters with the shapes SeqEmbedTarget.__init__ implies."""
    ks = jax.random.split(key, 17)
    E, K = EMBED, TARGET_NUM

    def u(k, shape, scale):
        return jax.random.uniform(k, shape, jnp.float32, -1.0, 1.0) * scale

    # LSTM (input_size=K, hidden_size=E); gate order i,f,g,o, stored (in, 4H)
    w_ih = u(ks[0], (K, 4 * E), 1.0 / np.sqrt(E))
    w_hh = u(ks[1], (E, 4 * E), 1.0 / np.sqrt(E))
    b_lstm = u(ks[2], (1, 4 * E), 1.0 / np.sqrt(E))        # b_ih + b_hh folded

    # decode MLP
    w1 = u(ks[3], (E, 4 * E), 1.0 / np.sqrt(E))
    b1 = u(ks[4], (1, 4 * E), 1.0 / np.sqrt(E))
    w2 = u(ks[5], (4 * E, 20 * E), 1.0 / np.sqrt(4 * E))
    b2 = u(ks[6], (1, 20 * E), 1.0 / np.sqrt(4 * E))
    w3 = u(ks[7], (20 * E, K), 1.0 / np.sqrt(20 * E))
    b3 = u(ks[8], (1, K), 1.0 / np.sqrt(20 * E))

    # BatchNorm1d parameters (eval mode), reduced to scale/bias
    def bn(kg, kb, km, kv, n):
        gamma = 1.0 + 0.1 * u(kg, (1, n), 1.0)
        beta = 0.1 * u(kb, (1, n), 1.0)
        mean = 0.1 * u(km, (1, n), 1.0)
        var = 1.0 + 0.1 * jax.random.uniform(kv, (1, n), jnp.float32)
        scale = gamma / jnp.sqrt(var + BN_EPS)
        bias = beta - mean * scale
        return scale, bias

    bn1_s, bn1_b = bn(ks[9], ks[10], ks[11], ks[12], 20 * E)
    bn2_s, bn2_b = bn(ks[13], ks[14], ks[15], ks[16], K)

    return dict(w_ih=w_ih, w_hh=w_hh, b_lstm=b_lstm,
                w1=w1, b1=b1, w2=w2, b2=b2, bn1_s=bn1_s, bn1_b=bn1_b,
                w3=w3, b3=b3, bn2_s=bn2_s, bn2_b=bn2_b)


def reference(labels, p):
    """Pure-JAX reference of the same forward pass on unfolded params (validation)."""
    B, S = labels.shape
    H = EMBED
    onehot = jax.nn.one_hot(labels, TARGET_NUM, dtype=jnp.float32)     # (B, S, K)
    h = jnp.zeros((B, H), jnp.float32)
    c = jnp.zeros((B, H), jnp.float32)
    for t in range(S):
        g = onehot[:, t] @ p["w_ih"] + h @ p["w_hh"] + p["b_lstm"]
        i_g = jax.nn.sigmoid(g[:, 0:H])
        f_g = jax.nn.sigmoid(g[:, H:2 * H])
        g_g = jnp.tanh(g[:, 2 * H:3 * H])
        o_g = jax.nn.sigmoid(g[:, 3 * H:4 * H])
        c = f_g * c + i_g * g_g
        h = o_g * jnp.tanh(c)
    out = jnp.maximum(h @ p["w1"] + p["b1"], 0.0)
    out = jnp.maximum((out @ p["w2"] + p["b2"]) * p["bn1_s"] + p["bn1_b"], 0.0)
    out = jnp.maximum((out @ p["w3"] + p["b3"]) * p["bn2_s"] + p["bn2_b"], 0.0)
    return jax.nn.log_softmax(out, axis=1)


if __name__ == "__main__":
    key = jax.random.PRNGKey(0)
    k_lab, k_par = jax.random.split(key)

    # module input: integer class labels (B, S) in [0, target_num)
    labels = jax.random.randint(k_lab, (BATCH, SEQ), 0, TARGET_NUM, dtype=jnp.int32)
    params = init_params(k_par)

    out = jax.block_until_ready(seq_embed_target(labels, params))
    ref = reference(labels, params)
    np.testing.assert_allclose(np.asarray(out), np.asarray(ref), rtol=1e-4, atol=1e-4)

    # TODO(synk): training-mode paths (teacher forcing with python `random`, BatchNorm
    # batch statistics) are stochastic/training-only and are not implemented.
    print("KERNEL_OK")
</pallas_src>

<mosaic_0001>
module attributes {stable_mosaic.version = 11 : i64} {
  func.func @seq_embed_kernel(%arg0: memref<8x2x128xf32, #tpu.memory_space<vmem>>, %arg1: memref<128x128xf32, #tpu.memory_space<vmem>>, %arg2: memref<128x128xf32, #tpu.memory_space<vmem>>, %arg3: memref<1x128xf32, #tpu.memory_space<vmem>>, %arg4: memref<128x640xf32, #tpu.memory_space<vmem>>, %arg5: memref<1x640xf32, #tpu.memory_space<vmem>>, %arg6: memref<640x10xf32, #tpu.memory_space<vmem>>, %arg7: memref<1x10xf32, #tpu.memory_space<vmem>>, %arg8: memref<2x10xf32, #tpu.memory_space<vmem>>) attributes {dimension_semantics = [], scalar_prefetch = 0 : i64, scratch_operands = 0 : i64, tpu.core_type = #tpu.core_type<tc>} {
    %c0 = arith.constant 0 : index
    %c0_0 = arith.constant 0 : index
    %0 = vector.load %arg1[%c0, %c0_0] : memref<128x128xf32, #tpu.memory_space<vmem>>, vector<128x128xf32>
    %cst = arith.constant 0.000000e+00 : f32
    %1 = vector.broadcast %cst : f32 to vector<2x128xf32>
    %c0_i32 = arith.constant 0 : i32
    %2 = arith.index_cast %c0_i32 : i32 to index
    %c0_1 = arith.constant 0 : index
    %c0_2 = arith.constant 0 : index
    %3 = vector.load %arg0[%2, %c0_1, %c0_2] : memref<8x2x128xf32, #tpu.memory_space<vmem>>, vector<1x2x128xf32>
    %4 = vector.shape_cast %3 : vector<1x2x128xf32> to vector<2x128xf32>
    %cst_3 = arith.constant dense<0.000000e+00> : vector<2x128xf32>
    %5 = tpu.matmul %1, %0, %cst_3 {dimension_numbers = #tpu.dot_dimension_numbers<[1], [0], [0], [1], [0, 0, 1, 1], [], []>} : vector<2x128xf32>, vector<128x128xf32>, vector<2x128xf32> -> vector<2x128xf32>
    %6 = arith.addf %4, %5 : vector<2x128xf32>
    %7 = arith.negf %6 : vector<2x128xf32>
    %8 = math.exp %7 : vector<2x128xf32>
    %cst_4 = arith.constant 1.000000e+00 : f32
    %9 = vector.broadcast %cst_4 : f32 to vector<2x128xf32>
    %10 = arith.addf %9, %8 : vector<2x128xf32>
    %11 = arith.divf %9, %10 : vector<2x128xf32>
    %12 = math.tanh %6 : vector<2x128xf32>
    %c96_i32 = arith.constant 96 : i32
    %13 = tpu.dynamic_rotate %11 by %c96_i32 dim 1 : vector<2x128xf32>, i32 -> vector<2x128xf32>
    %c64_i32 = arith.constant 64 : i32
    %14 = tpu.dynamic_rotate %12 by %c64_i32 dim 1 : vector<2x128xf32>, i32 -> vector<2x128xf32>
    %c32_i32 = arith.constant 32 : i32
    %15 = tpu.dynamic_rotate %11 by %c32_i32 dim 1 : vector<2x128xf32>, i32 -> vector<2x128xf32>
    %16 = arith.mulf %13, %1 : vector<2x128xf32>
    %17 = arith.mulf %11, %14 : vector<2x128xf32>
    %18 = arith.addf %16, %17 : vector<2x128xf32>
    %19 = math.tanh %18 : vector<2x128xf32>
    %20 = arith.mulf %15, %19 : vector<2x128xf32>
    %c1_i32 = arith.constant 1 : i32
    %21 = arith.index_cast %c1_i32 : i32 to index
    %c0_5 = arith.constant 0 : index
    %c0_6 = arith.constant 0 : index
    %22 = vector.load %arg0[%21, %c0_5, %c0_6] : memref<8x2x128xf32, #tpu.memory_space<vmem>>, vector<1x2x128xf32>
    %23 = vector.shape_cast %22 : vector<1x2x128xf32> to vector<2x128xf32>
    %cst_7 = arith.constant dense<0.000000e+00> : vector<2x128xf32>
    %24 = tpu.matmul %20, %0, %cst_7 {dimension_numbers = #tpu.dot_dimension_numbers<[1], [0], [0], [1], [0, 0, 1, 1], [], []>} : vector<2x128xf32>, vector<128x128xf32>, vector<2x128xf32> -> vector<2x128xf32>
    %25 = arith.addf %23, %24 : vector<2x128xf32>
    %26 = arith.negf %25 : vector<2x128xf32>
    %27 = math.exp %26 : vector<2x128xf32>
    %cst_8 = arith.constant 1.000000e+00 : f32
    %28 = vector.broadcast %cst_8 : f32 to vector<2x128xf32>
    %29 = arith.addf %28, %27 : vector<2x128xf32>
    %30 = arith.divf %28, %29 : vector<2x128xf32>
    %31 = math.tanh %25 : vector<2x128xf32>
    %c96_i32_9 = arith.constant 96 : i32
    %32 = tpu.dynamic_rotate %30 by %c96_i32_9 dim 1 : vector<2x128xf32>, i32 -> vector<2x128xf32>
    %c64_i32_10 = arith.constant 64 : i32
    %33 = tpu.dynamic_rotate %31 by %c64_i32_10 dim 1 : vector<2x128xf32>, i32 -> vector<2x128xf32>
    %c32_i32_11 = arith.constant 32 : i32
    %34 = tpu.dynamic_rotate %30 by %c32_i32_11 dim 1 : vector<2x128xf32>, i32 -> vector<2x128xf32>
    %35 = arith.mulf %32, %18 : vector<2x128xf32>
    %36 = arith.mulf %30, %33 : vector<2x128xf32>
    %37 = arith.addf %35, %36 : vector<2x128xf32>
    %38 = math.tanh %37 : vector<2x128xf32>
    %39 = arith.mulf %34, %38 : vector<2x128xf32>
    %c2_i32 = arith.constant 2 : i32
    %40 = arith.index_cast %c2_i32 : i32 to index
    %c0_12 = arith.constant 0 : index
    %c0_13 = arith.constant 0 : index
    %41 = vector.load %arg0[%40, %c0_12, %c0_13] : memref<8x2x128xf32, #tpu.memory_space<vmem>>, vector<1x2x128xf32>
    %42 = vector.shape_cast %41 : vector<1x2x128xf32> to vector<2x128xf32>
    %cst_14 = arith.constant dense<0.000000e+00> : vector<2x128xf32>
    %43 = tpu.matmul %39, %0, %cst_14 {dimension_numbers = #tpu.dot_dimension_numbers<[1], [0], [0], [1], [0, 0, 1, 1], [], []>} : vector<2x128xf32>, vector<128x128xf32>, vector<2x128xf32> -> vector<2x128xf32>
    %44 = arith.addf %42, %43 : vector<2x128xf32>
    %45 = arith.negf %44 : vector<2x128xf32>
    %46 = math.exp %45 : vector<2x128xf32>
    %cst_15 = arith.constant 1.000000e+00 : f32
    %47 = vector.broadcast %cst_15 : f32 to vector<2x128xf32>
    %48 = arith.addf %47, %46 : vector<2x128xf32>
    %49 = arith.divf %47, %48 : vector<2x128xf32>
    %50 = math.tanh %44 : vector<2x128xf32>
    %c96_i32_16 = arith.constant 96 : i32
    %51 = tpu.dynamic_rotate %49 by %c96_i32_16 dim 1 : vector<2x128xf32>, i32 -> vector<2x128xf32>
    %c64_i32_17 = arith.constant 64 : i32
    %52 = tpu.dynamic_rotate %50 by %c64_i32_17 dim 1 : vector<2x128xf32>, i32 -> vector<2x128xf32>
    %c32_i32_18 = arith.constant 32 : i32
    %53 = tpu.dynamic_rotate %49 by %c32_i32_18 dim 1 : vector<2x128xf32>, i32 -> vector<2x128xf32>
    %54 = arith.mulf %51, %37 : vector<2x128xf32>
    %55 = arith.mulf %49, %52 : vector<2x128xf32>
    %56 = arith.addf %54, %55 : vector<2x128xf32>
    %57 = math.tanh %56 : vector<2x128xf32>
    %58 = arith.mulf %53, %57 : vector<2x128xf32>
    %c3_i32 = arith.constant 3 : i32
    %59 = arith.index_cast %c3_i32 : i32 to index
    %c0_19 = arith.constant 0 : index
    %c0_20 = arith.constant 0 : index
    %60 = vector.load %arg0[%59, %c0_19, %c0_20] : memref<8x2x128xf32, #tpu.memory_space<vmem>>, vector<1x2x128xf32>
    %61 = vector.shape_cast %60 : vector<1x2x128xf32> to vector<2x128xf32>
    %cst_21 = arith.constant dense<0.000000e+00> : vector<2x128xf32>
    %62 = tpu.matmul %58, %0, %cst_21 {dimension_numbers = #tpu.dot_dimension_numbers<[1], [0], [0], [1], [0, 0, 1, 1], [], []>} : vector<2x128xf32>, vector<128x128xf32>, vector<2x128xf32> -> vector<2x128xf32>
    %63 = arith.addf %61, %62 : vector<2x128xf32>
    %64 = arith.negf %63 : vector<2x128xf32>
    %65 = math.exp %64 : vector<2x128xf32>
    %cst_22 = arith.constant 1.000000e+00 : f32
    %66 = vector.broadcast %cst_22 : f32 to vector<2x128xf32>
    %67 = arith.addf %66, %65 : vector<2x128xf32>
    %68 = arith.divf %66, %67 : vector<2x128xf32>
    %69 = math.tanh %63 : vector<2x128xf32>
    %c96_i32_23 = arith.constant 96 : i32
    %70 = tpu.dynamic_rotate %68 by %c96_i32_23 dim 1 : vector<2x128xf32>, i32 -> vector<2x128xf32>
    %c64_i32_24 = arith.constant 64 : i32
    %71 = tpu.dynamic_rotate %69 by %c64_i32_24 dim 1 : vector<2x128xf32>, i32 -> vector<2x128xf32>
    %c32_i32_25 = arith.constant 32 : i32
    %72 = tpu.dynamic_rotate %68 by %c32_i32_25 dim 1 : vector<2x128xf32>, i32 -> vector<2x128xf32>
    %73 = arith.mulf %70, %56 : vector<2x128xf32>
    %74 = arith.mulf %68, %71 : vector<2x128xf32>
    %75 = arith.addf %73, %74 : vector<2x128xf32>
    %76 = math.tanh %75 : vector<2x128xf32>
    %77 = arith.mulf %72, %76 : vector<2x128xf32>
    %c4_i32 = arith.constant 4 : i32
    %78 = arith.index_cast %c4_i32 : i32 to index
    %c0_26 = arith.constant 0 : index
    %c0_27 = arith.constant 0 : index
    %79 = vector.load %arg0[%78, %c0_26, %c0_27] : memref<8x2x128xf32, #tpu.memory_space<vmem>>, vector<1x2x128xf32>
    %80 = vector.shape_cast %79 : vector<1x2x128xf32> to vector<2x128xf32>
    %cst_28 = arith.constant dense<0.000000e+00> : vector<2x128xf32>
    %81 = tpu.matmul %77, %0, %cst_28 {dimension_numbers = #tpu.dot_dimension_numbers<[1], [0], [0], [1], [0, 0, 1, 1], [], []>} : vector<2x128xf32>, vector<128x128xf32>, vector<2x128xf32> -> vector<2x128xf32>
    %82 = arith.addf %80, %81 : vector<2x128xf32>
    %83 = arith.negf %82 : vector<2x128xf32>
    %84 = math.exp %83 : vector<2x128xf32>
    %cst_29 = arith.constant 1.000000e+00 : f32
    %85 = vector.broadcast %cst_29 : f32 to vector<2x128xf32>
    %86 = arith.addf %85, %84 : vector<2x128xf32>
    %87 = arith.divf %85, %86 : vector<2x128xf32>
    %88 = math.tanh %82 : vector<2x128xf32>
    %c96_i32_30 = arith.constant 96 : i32
    %89 = tpu.dynamic_rotate %87 by %c96_i32_30 dim 1 : vector<2x128xf32>, i32 -> vector<2x128xf32>
    %c64_i32_31 = arith.constant 64 : i32
    %90 = tpu.dynamic_rotate %88 by %c64_i32_31 dim 1 : vector<2x128xf32>, i32 -> vector<2x128xf32>
    %c32_i32_32 = arith.constant 32 : i32
    %91 = tpu.dynamic_rotate %87 by %c32_i32_32 dim 1 : vector<2x128xf32>, i32 -> vector<2x128xf32>
    %92 = arith.mulf %89, %75 : vector<2x128xf32>
    %93 = arith.mulf %87, %90 : vector<2x128xf32>
    %94 = arith.addf %92, %93 : vector<2x128xf32>
    %95 = math.tanh %94 : vector<2x128xf32>
    %96 = arith.mulf %91, %95 : vector<2x128xf32>
    %c5_i32 = arith.constant 5 : i32
    %97 = arith.index_cast %c5_i32 : i32 to index
    %c0_33 = arith.constant 0 : index
    %c0_34 = arith.constant 0 : index
    %98 = vector.load %arg0[%97, %c0_33, %c0_34] : memref<8x2x128xf32, #tpu.memory_space<vmem>>, vector<1x2x128xf32>
    %99 = vector.shape_cast %98 : vector<1x2x128xf32> to vector<2x128xf32>
    %cst_35 = arith.constant dense<0.000000e+00> : vector<2x128xf32>
    %100 = tpu.matmul %96, %0, %cst_35 {dimension_numbers = #tpu.dot_dimension_numbers<[1], [0], [0], [1], [0, 0, 1, 1], [], []>} : vector<2x128xf32>, vector<128x128xf32>, vector<2x128xf32> -> vector<2x128xf32>
    %101 = arith.addf %99, %100 : vector<2x128xf32>
    %102 = arith.negf %101 : vector<2x128xf32>
    %103 = math.exp %102 : vector<2x128xf32>
    %cst_36 = arith.constant 1.000000e+00 : f32
    %104 = vector.broadcast %cst_36 : f32 to vector<2x128xf32>
    %105 = arith.addf %104, %103 : vector<2x128xf32>
    %106 = arith.divf %104, %105 : vector<2x128xf32>
    %107 = math.tanh %101 : vector<2x128xf32>
    %c96_i32_37 = arith.constant 96 : i32
    %108 = tpu.dynamic_rotate %106 by %c96_i32_37 dim 1 : vector<2x128xf32>, i32 -> vector<2x128xf32>
    %c64_i32_38 = arith.constant 64 : i32
    %109 = tpu.dynamic_rotate %107 by %c64_i32_38 dim 1 : vector<2x128xf32>, i32 -> vector<2x128xf32>
    %c32_i32_39 = arith.constant 32 : i32
    %110 = tpu.dynamic_rotate %106 by %c32_i32_39 dim 1 : vector<2x128xf32>, i32 -> vector<2x128xf32>
    %111 = arith.mulf %108, %94 : vector<2x128xf32>
    %112 = arith.mulf %106, %109 : vector<2x128xf32>
    %113 = arith.addf %111, %112 : vector<2x128xf32>
    %114 = math.tanh %113 : vector<2x128xf32>
    %115 = arith.mulf %110, %114 : vector<2x128xf32>
    %c6_i32 = arith.constant 6 : i32
    %116 = arith.index_cast %c6_i32 : i32 to index
    %c0_40 = arith.constant 0 : index
    %c0_41 = arith.constant 0 : index
    %117 = vector.load %arg0[%116, %c0_40, %c0_41] : memref<8x2x128xf32, #tpu.memory_space<vmem>>, vector<1x2x128xf32>
    %118 = vector.shape_cast %117 : vector<1x2x128xf32> to vector<2x128xf32>
    %cst_42 = arith.constant dense<0.000000e+00> : vector<2x128xf32>
    %119 = tpu.matmul %115, %0, %cst_42 {dimension_numbers = #tpu.dot_dimension_numbers<[1], [0], [0], [1], [0, 0, 1, 1], [], []>} : vector<2x128xf32>, vector<128x128xf32>, vector<2x128xf32> -> vector<2x128xf32>
    %120 = arith.addf %118, %119 : vector<2x128xf32>
    %121 = arith.negf %120 : vector<2x128xf32>
    %122 = math.exp %121 : vector<2x128xf32>
    %cst_43 = arith.constant 1.000000e+00 : f32
    %123 = vector.broadcast %cst_43 : f32 to vector<2x128xf32>
    %124 = arith.addf %123, %122 : vector<2x128xf32>
    %125 = arith.divf %123, %124 : vector<2x128xf32>
    %126 = math.tanh %120 : vector<2x128xf32>
    %c96_i32_44 = arith.constant 96 : i32
    %127 = tpu.dynamic_rotate %125 by %c96_i32_44 dim 1 : vector<2x128xf32>, i32 -> vector<2x128xf32>
    %c64_i32_45 = arith.constant 64 : i32
    %128 = tpu.dynamic_rotate %126 by %c64_i32_45 dim 1 : vector<2x128xf32>, i32 -> vector<2x128xf32>
    %c32_i32_46 = arith.constant 32 : i32
    %129 = tpu.dynamic_rotate %125 by %c32_i32_46 dim 1 : vector<2x128xf32>, i32 -> vector<2x128xf32>
    %130 = arith.mulf %127, %113 : vector<2x128xf32>
    %131 = arith.mulf %125, %128 : vector<2x128xf32>
    %132 = arith.addf %130, %131 : vector<2x128xf32>
    %133 = math.tanh %132 : vector<2x128xf32>
    %134 = arith.mulf %129, %133 : vector<2x128xf32>
    %c7_i32 = arith.constant 7 : i32
    %135 = arith.index_cast %c7_i32 : i32 to index
    %c0_47 = arith.constant 0 : index
    %c0_48 = arith.constant 0 : index
    %136 = vector.load %arg0[%135, %c0_47, %c0_48] : memref<8x2x128xf32, #tpu.memory_space<vmem>>, vector<1x2x128xf32>
    %137 = vector.shape_cast %136 : vector<1x2x128xf32> to vector<2x128xf32>
    %cst_49 = arith.constant dense<0.000000e+00> : vector<2x128xf32>
    %138 = tpu.matmul %134, %0, %cst_49 {dimension_numbers = #tpu.dot_dimension_numbers<[1], [0], [0], [1], [0, 0, 1, 1], [], []>} : vector<2x128xf32>, vector<128x128xf32>, vector<2x128xf32> -> vector<2x128xf32>
    %139 = arith.addf %137, %138 : vector<2x128xf32>
    %140 = arith.negf %139 : vector<2x128xf32>
    %141 = math.exp %140 : vector<2x128xf32>
    %cst_50 = arith.constant 1.000000e+00 : f32
    %142 = vector.broadcast %cst_50 : f32 to vector<2x128xf32>
    %143 = arith.addf %142, %141 : vector<2x128xf32>
    %144 = arith.divf %142, %143 : vector<2x128xf32>
    %145 = math.tanh %139 : vector<2x128xf32>
    %c96_i32_51 = arith.constant 96 : i32
    %146 = tpu.dynamic_rotate %144 by %c96_i32_51 dim 1 : vector<2x128xf32>, i32 -> vector<2x128xf32>
    %c64_i32_52 = arith.constant 64 : i32
    %147 = tpu.dynamic_rotate %145 by %c64_i32_52 dim 1 : vector<2x128xf32>, i32 -> vector<2x128xf32>
    %c32_i32_53 = arith.constant 32 : i32
    %148 = tpu.dynamic_rotate %144 by %c32_i32_53 dim 1 : vector<2x128xf32>, i32 -> vector<2x128xf32>
    %149 = arith.mulf %146, %132 : vector<2x128xf32>
    %150 = arith.mulf %144, %147 : vector<2x128xf32>
    %151 = arith.addf %149, %150 : vector<2x128xf32>
    %152 = math.tanh %151 : vector<2x128xf32>
    %153 = arith.mulf %148, %152 : vector<2x128xf32>
    %c8_i32 = arith.constant 8 : i32
    %c0_54 = arith.constant 0 : index
    %c0_55 = arith.constant 0 : index
    %154 = vector.load %arg2[%c0_54, %c0_55] : memref<128x128xf32, #tpu.memory_space<vmem>>, vector<128x128xf32>
    %cst_56 = arith.constant dense<0.000000e+00> : vector<2x128xf32>
    %155 = tpu.matmul %153, %154, %cst_56 {dimension_numbers = #tpu.dot_dimension_numbers<[1], [0], [0], [1], [0, 0, 1, 1], [], []>} : vector<2x128xf32>, vector<128x128xf32>, vector<2x128xf32> -> vector<2x128xf32>
    %c0_57 = arith.constant 0 : index
    %c0_58 = arith.constant 0 : index
    %156 = vector.load %arg3[%c0_57, %c0_58] : memref<1x128xf32, #tpu.memory_space<vmem>>, vector<1x128xf32>
    %157 = vector.broadcast %156 : vector<1x128xf32> to vector<2x128xf32>
    %158 = arith.addf %155, %157 : vector<2x128xf32>
    %cst_59 = arith.constant 0.000000e+00 : f32
    %159 = vector.broadcast %cst_59 : f32 to vector<2x128xf32>
    %160 = arith.maximumf %158, %159 : vector<2x128xf32>
    %c0_60 = arith.constant 0 : index
    %c0_61 = arith.constant 0 : index
    %161 = vector.load %arg4[%c0_60, %c0_61] : memref<128x640xf32, #tpu.memory_space<vmem>>, vector<128x640xf32>
    %cst_62 = arith.constant dense<0.000000e+00> : vector<2x640xf32>
    %162 = tpu.matmul %160, %161, %cst_62 {dimension_numbers = #tpu.dot_dimension_numbers<[1], [0], [0], [1], [0, 0, 1, 1], [], []>} : vector<2x128xf32>, vector<128x640xf32>, vector<2x640xf32> -> vector<2x640xf32>
    %c0_63 = arith.constant 0 : index
    %c0_64 = arith.constant 0 : index
    %163 = vector.load %arg5[%c0_63, %c0_64] : memref<1x640xf32, #tpu.memory_space<vmem>>, vector<1x640xf32>
    %164 = vector.broadcast %163 : vector<1x640xf32> to vector<2x640xf32>
    %165 = arith.addf %162, %164 : vector<2x640xf32>
    %cst_65 = arith.constant 0.000000e+00 : f32
    %166 = vector.broadcast %cst_65 : f32 to vector<2x640xf32>
    %167 = arith.maximumf %165, %166 : vector<2x640xf32>
    %c0_66 = arith.constant 0 : index
    %c0_67 = arith.constant 0 : index
    %168 = vector.load %arg6[%c0_66, %c0_67] : memref<640x10xf32, #tpu.memory_space<vmem>>, vector<640x10xf32>
    %cst_68 = arith.constant dense<0.000000e+00> : vector<2x10xf32>
    %169 = tpu.matmul %167, %168, %cst_68 {dimension_numbers = #tpu.dot_dimension_numbers<[1], [0], [0], [1], [0, 0, 1, 1], [], []>} : vector<2x640xf32>, vector<640x10xf32>, vector<2x10xf32> -> vector<2x10xf32>
    %c0_69 = arith.constant 0 : index
    %c0_70 = arith.constant 0 : index
    %170 = vector.load %arg7[%c0_69, %c0_70] : memref<1x10xf32, #tpu.memory_space<vmem>>, vector<1x10xf32>
    %171 = vector.broadcast %170 : vector<1x10xf32> to vector<2x10xf32>
    %172 = arith.addf %169, %171 : vector<2x10xf32>
    %cst_71 = arith.constant 0.000000e+00 : f32
    %173 = vector.broadcast %cst_71 : f32 to vector<2x10xf32>
    %174 = arith.maximumf %172, %173 : vector<2x10xf32>
    %cst_72 = arith.constant dense<0xFF800000> : vector<2xf32>
    %175 = vector.multi_reduction <maximumf>, %174, %cst_72 [1] : vector<2x10xf32> to vector<2xf32>
    %176 = vector.shape_cast %175 : vector<2xf32> to vector<2x1xf32>
    %177 = vector.broadcast %176 : vector<2x1xf32> to vector<2x10xf32>
    %178 = arith.subf %174, %177 : vector<2x10xf32>
    %179 = math.exp %178 : vector<2x10xf32>
    %cst_73 = arith.constant dense<0.000000e+00> : vector<2xf32>
    %180 = vector.multi_reduction <add>, %179, %cst_73 [1] : vector<2x10xf32> to vector<2xf32>
    %181 = vector.shape_cast %180 : vector<2xf32> to vector<2x1xf32>
    %182 = math.log %181 : vector<2x1xf32>
    %183 = vector.broadcast %182 : vector<2x1xf32> to vector<2x10xf32>
    %184 = arith.subf %178, %183 : vector<2x10xf32>
    %c0_74 = arith.constant 0 : index
    %c0_75 = arith.constant 0 : index
    %185 = vector.load %arg8[%c0_74, %c0_75] : memref<2x10xf32, #tpu.memory_space<vmem>>, vector<2x10xf32>
    tpu.vector_store %arg8[%c0_74, %c0_75], %184 {strides = array<i32>} : memref<2x10xf32, #tpu.memory_space<vmem>>, vector<2x10xf32>,
    return
  }
}

</mosaic_0001>

<bundles_post_ra>
// kernel: tpu_custom_call.1
= control target key start
LH: loop header
LB: loop body
LE: loop exit
PB: predicated region body
PF: predicated region fallthrough
CT: control target
= control target key end

     0   :  { %13 = vsyncpa [#allocation3], 0  ;;  %s3588_s0 = inlined_call_operand.vmem [shape: f32[8,2,128], index: 0, kind: input, shape index: {}]   ;;  %s3589_s1 = inlined_call_operand.hbm [shape: f32[128,128], index: 1, kind: input, shape index: {}]   ;;  %s3590_s2 = inlined_call_operand.hbm [shape: f32[128,128], index: 2, kind: input, shape index: {}]   ;;  %s3591_s3 = inlined_call_operand.vmem [shape: f32[1,128], index: 3, kind: input, shape index: {}]   ;;  %s3592_s4 = inlined_call_operand.vmem [shape: f32[128,640], index: 4, kind: input, shape index: {}]   ;;  %s3593_s5 = inlined_call_operand.vmem [shape: f32[1,640], index: 5, kind: input, shape index: {}]   ;;  %s3594_s6 = inlined_call_operand.vmem [shape: f32[640,10], index: 6, kind: input, shape index: {}]   ;;  %s3595_s7 = inlined_call_operand.vmem [shape: f32[1,10], index: 7, kind: input, shape index: {}]   ;;  %s3596_s8 = inlined_call_operand.hbm [shape: f32[2,10], index: 8, kind: output, shape index: {}]  }
   0x1   :  { %14 = vsyncpa [#allocation6], 0 }
   0x2   :  { %15 = vsyncpa [#allocation4], 0  ;;  %s2749_s27 = smov [#allocation2]   ;;  %s2677_s9 = scalar_lea.hbm %s3589_s1, 2048 }
   0x3   :  { %s23_s28 = sshll.u32 %s2749_s27, 4  ;;  %p2678_p0 = scmp.ne.s32.totalorder %s3589_s1, %s2677_s9  ;;  %s24_s28 = int_to_ptr.vmem [resolvable:$true] %s23_s28 }
   0x4   :  { %p2681_p1 = scmp.lt.u32.totalorder %s2677_s9, %s3589_s1 }
   0x6   :  { %p2683_p2 = pnand %p2681_p1, %p2678_p0 }
   0x8   :  { %2686 = shalt.err (!%p2683_p2)
}
   0x9   :  { %s2687_s14 = scalar_lea.vmem %s24_s28, 2048  ;;  %p2692_p4 = scmp.lt.s32.totalorder %s24_s28, %s24_s28 }
   0xa   :  { %p2688_p3 = scmp.ne.s32.totalorder %s24_s28, %s2687_s14  ;;  %p2693_p5 = scmp.lt.s32.totalorder %s2687_s14, %s2687_s14 }
   0xc   :  { %p2694_p6 = por %p2693_p5, %p2692_p4 }
   0xe   :  { %p2695_p7 = pnand %p2694_p6, %p2688_p3 }
  0x10   :  { %2698 = shalt.err (!%p2695_p7)
}
  0x11   :  { %s2750_s15 = smov 128   ;;  %s2751_s16 = smov 8  }
  0x12   :  { %29 = dma.hbm_to_vmem [thread:$0]  %s3589_s1, 2048, %s24_s28, [#allocation3], %s2750_s15, %s2750_s15, %s2751_s16  }
  0x13   :  { %s2752_s19 = smov [#allocation5]   ;;  %s2699_s23 = scalar_lea.hbm %s3590_s2, 2048 }
  0x14   :  { %s35_s20 = sshll.u32 %s2752_s19, 4  ;;  %p2700_p8 = scmp.ne.s32.totalorder %s3590_s2, %s2699_s23  ;;  %s36_s20 = int_to_ptr.vmem [resolvable:$true] %s35_s20 }
  0x15   :  { %p2703_p9 = scmp.lt.u32.totalorder %s2699_s23, %s3590_s2 }
  0x17   :  { %p2705_p10 = pnand %p2703_p9, %p2700_p8 }
  0x19   :  { %2708 = shalt.err (!%p2705_p10)
}
  0x1a   :  { %s2709_s29 = scalar_lea.vmem %s36_s20, 2048  ;;  %p2714_p12 = scmp.lt.s32.totalorder %s36_s20, %s36_s20 }
  0x1b   :  { %p2710_p11 = scmp.ne.s32.totalorder %s36_s20, %s2709_s29  ;;  %p2715_p13 = scmp.lt.s32.totalorder %s2709_s29, %s2709_s29 }
  0x1d   :  { %p2716_p0 = por %p2715_p13, %p2714_p12 }
  0x1f   :  { %p2717_p1 = pnand %p2716_p0, %p2710_p11 }
  0x21   :  { %2720 = shalt.err (!%p2717_p1)
}
  0x22   :  { %41 = dma.hbm_to_vmem [thread:$0]  %s3590_s2, 2048, %s36_s20, [#allocation6], %s2750_s15, %s2750_s15, %s2751_s16  }
  0x23   :  { %2743 = dma.done.wait [#allocation3], 2048  }
  0x24   :  { %2744 = vsyncadd [#allocation3], 4294965248 }
  0x25   :  { %2745 = dma.done.wait [#allocation6], 2048  }
  0x26   :  { %2746 = vsyncadd [#allocation6], 4294965248  ;;  %v2753_v0 = vmov 0.0|0.0   ;;  %vm2754_vm0 = vmmov 0   ;;  %v2755_v1 = vmov 0.0   ;;  %v58_v2 = vld [vmem:[#allocation2] sm:$0xff] }
  0x27   :  { %2206 = vmatprep.subr.bf16.mxu0 %v2753_v0  ;;  %1853 = vmatprep.mubr.msk.f32.mxu0 %vm2754_vm0, %v2755_v1  ;;  %v59_v3 = vld [vmem:[#allocation2 + $0x8] sm:$0xff]  ;;  %v60_v4 = vld [vmem:[#allocation2 + $0x10] sm:$0xff]  ;;  %v61_v6 = vld [vmem:[#allocation2 + $0x18] sm:$0xff]  ;;  %s2756_s9 = smov 32   ;;  %s2757_s10 = smov 96   ;;  %vm1517_vm1 = vcmask 74752  }
  0x28   :  { %2230 = vmatprep.subr.bf16.mxu1 %v2753_v0  ;;  %1888 = vmatprep.mubr.msk.f32.mxu1 %vm2754_vm0, %v2755_v1  ;;  %v2835_v5 = vpack.c.bf16 %v59_v3, %v58_v2  ;;  %v2838_v7 = vpack.c.bf16 %v61_v6, %v60_v4  ;;  %v62_v8 = vld [vmem:[#allocation2 + $0x20] sm:$0xff]  ;;  %v63_v9 = vld [vmem:[#allocation2 + $0x28] sm:$0xff]  ;;  %v64_v11 = vld [vmem:[#allocation2 + $0x30] sm:$0xff]  ;;  %s2758_s11 = smov 64  }
  0x29   :  { %v2844_v10 = vpack.c.bf16 %v63_v9, %v62_v8  ;;  %v65_v12 = vld [vmem:[#allocation2 + $0x38] sm:$0xff]  ;;  %v66_v14 = vld [vmem:[#allocation2 + $0x40] sm:$0xff]  ;;  %v67_v15 = vld [vmem:[#allocation2 + $0x48] sm:$0xff] }
  0x2a   :  { %2208 = vmatpush3.bf16.msra.mxu0 %v2835_v5  ;;  %2232 = vmatpush3.bf16.msra.mxu1 %v2835_v5  ;;  %v2850_v13 = vpack.c.bf16 %v65_v12, %v64_v11  ;;  %v2856_v16 = vpack.c.bf16 %v67_v15, %v66_v14  ;;  %v68_v17 = vld [vmem:[#allocation2 + $0x50] sm:$0xff]  ;;  %v69_v18 = vld [vmem:[#allocation2 + $0x58] sm:$0xff]  ;;  %v70_v20 = vld [vmem:[#allocation2 + $0x60] sm:$0xff] }
  0x2b   :  { %2209 = vmatprep.subr.bf16.mxu0 %v2753_v0  ;;  %2233 = vmatprep.subr.bf16.mxu1 %v2753_v0  ;;  %v2862_v19 = vpack.c.bf16 %v69_v18, %v68_v17  ;;  %v71_v21 = vld [vmem:[#allocation2 + $0x68] sm:$0xff]  ;;  %v72_v23 = vld [vmem:[#allocation2 + $0x70] sm:$0xff]  ;;  %v73_v24 = vld [vmem:[#allocation2 + $0x78] sm:$0xff] }
  0x2c   :  { %v2868_v22 = vpack.c.bf16 %v71_v21, %v70_v20  ;;  %v2874_v25 = vpack.c.bf16 %v73_v24, %v72_v23  ;;  %v74_v26 = vld [vmem:[%s3588_s0] sm:$0x3]  ;;  %v1548_v43 = vld [vmem:[%s3588_s0 + $0x2] sm:$0x3]  ;;  %v1550_v60 = vld [vmem:[%s3588_s0 + $0x4] sm:$0x3] }
  0x2d   :  { %v1552_v21 = vld [vmem:[%s3588_s0 + $0x6] sm:$0x3] }
  0x2e   :  { %2211 = vmatpush3.bf16.msra.mxu0 %v2838_v7  ;;  %2235 = vmatpush3.bf16.msra.mxu1 %v2838_v7 }
  0x2f   :  { %2212 = vmatprep.subr.bf16.mxu0 %v2753_v0  ;;  %2236 = vmatprep.subr.bf16.mxu1 %v2753_v0 }
  0x32   :  { %2214 = vmatpush3.bf16.msra.mxu0 %v2844_v10  ;;  %2238 = vmatpush3.bf16.msra.mxu1 %v2844_v10 }
  0x33   :  { %2215 = vmatprep.subr.bf16.mxu0 %v2753_v0  ;;  %2239 = vmatprep.subr.bf16.mxu1 %v2753_v0 }
  0x36   :  { %2217 = vmatpush3.bf16.msra.mxu0 %v2850_v13  ;;  %2241 = vmatpush3.bf16.msra.mxu1 %v2850_v13 }
  0x37   :  { %2218 = vmatprep.subr.bf16.mxu0 %v2753_v0  ;;  %2242 = vmatprep.subr.bf16.mxu1 %v2753_v0 }
  0x3a   :  { %2220 = vmatpush3.bf16.msra.mxu0 %v2856_v16  ;;  %2244 = vmatpush3.bf16.msra.mxu1 %v2856_v16 }
  0x3b   :  { %2221 = vmatprep.subr.bf16.mxu0 %v2753_v0  ;;  %2245 = vmatprep.subr.bf16.mxu1 %v2753_v0 }
  0x3e   :  { %2223 = vmatpush3.bf16.msra.mxu0 %v2862_v19  ;;  %2247 = vmatpush3.bf16.msra.mxu1 %v2862_v19 }
  0x3f   :  { %2224 = vmatprep.subr.bf16.mxu0 %v2753_v0  ;;  %2248 = vmatprep.subr.bf16.mxu1 %v2753_v0 }
  0x42   :  { %2226 = vmatpush3.bf16.msra.mxu0 %v2868_v22  ;;  %2250 = vmatpush3.bf16.msra.mxu1 %v2868_v22 }
  0x43   :  { %2227 = vmatprep.subr.bf16.mxu0 %v2753_v0  ;;  %2251 = vmatprep.subr.bf16.mxu1 %v2753_v0 }
  0x46   :  { %2229 = vmatpush3.bf16.msra.mxu0 %v2874_v25  ;;  %2253 = vmatpush3.bf16.msra.mxu1 %v2874_v25 }
  0x47   :  { %2254 = vmatprep.subr.bf16.mxu0 %v2753_v0  ;;  %2278 = vmatprep.subr.bf16.mxu1 %v2753_v0 }
  0x49   :  { %1854 = vmatmul.mubr.f32.vlgmr.msra.gmra.mrb[0].mxu0 %v2755_v1 }
  0x4a   :  { %2256 = vmatpush3.bf16.msra.mxu0 %v2835_v5  ;;  %1923 = vmatprep.mubr.msk.f32.mxu0 %vm2754_vm0, %v2755_v1 }
  0x4b   :  { %2257 = vmatprep.subr.bf16.mxu0 %v2753_v0 }
  0x4e   :  { %2259 = vmatpush3.bf16.msra.mxu0 %v2838_v7 }
  0x4f   :  { %2260 = vmatprep.subr.bf16.mxu0 %v2753_v0 }
  0x52   :  { %2262 = vmatpush3.bf16.msra.mxu0 %v2844_v10 }
  0x53   :  { %2263 = vmatprep.subr.bf16.mxu0 %v2753_v0 }
  0x56   :  { %2265 = vmatpush3.bf16.msra.mxu0 %v2850_v13 }
  0x57   :  { %2266 = vmatprep.subr.bf16.mxu0 %v2753_v0 }
  0x5a   :  { %2268 = vmatpush3.bf16.msra.mxu0 %v2856_v16 }
  0x5b   :  { %2269 = vmatprep.subr.bf16.mxu0 %v2753_v0 }
  0x5e   :  { %2271 = vmatpush3.bf16.msra.mxu0 %v2862_v19 }
  0x5f   :  { %2272 = vmatprep.subr.bf16.mxu0 %v2753_v0 }
  0x62   :  { %2274 = vmatpush3.bf16.msra.mxu0 %v2868_v22 }
  0x63   :  { %2275 = vmatprep.subr.bf16.mxu0 %v2753_v0 }
  0x66   :  { %2277 = vmatpush3.bf16.msra.mxu0 %v2874_v25 }
  0x67   :  { %2302 = vmatprep.subr.bf16.mxu0 %v2753_v0 }
 0x11c   :  { %v141_v27 = vpop.f32.mrb[0].mxu0 }
 0x11d   :  { %v145_v28 = vadd.f32 %v141_v27, %v74_v26  ;;  %v1855_v29 = vpop.f32.mrb[1].mxu0 }
 0x11f   :  { %v1547_v30 = vmul.f32 -1.442695, %v145_v28 }
 0x121   :  { %2609 = vpow2.f32 %v1547_v30 }
 0x12b   :  { %v2610_v31 = vpop.eup %2609 }
 0x12c   :  { %v149_v32 = vadd.f32 1.0, %v2610_v31 }
 0x12e   :  { %2611 = vrcp.f32 %v149_v32 }
 0x12f   :  { %2613 = vtanh.f32 %v145_v28 }
 0x138   :  { %v2612_v33 = vpop.eup %2611 }
 0x139   :  { %157 = vrot.lane.b32.xlu1 %v2612_v33, %s2756_s9  ;;  %153 = vrot.lane.b32.xlu0 %v2612_v33, %s2757_s10  ;;  %v2614_v34 = vpop.eup %2613 }
 0x13d   :  { %155 = vrot.lane.b32.xlu0 %v2614_v34, %s2758_s11 }
 0x1ab   :  { %v154_v35 = vpop.permute.xlu0 %153  ;;  %v158_v41 = vpop.permute.xlu1 %157 }
 0x1ac   :  { %v159_v37 = vmul.f32 0.0, %v154_v35 }
 0x1af   :  { %v156_v36 = vpop.permute.xlu0 %155 }
 0x1b0   :  { %v160_v38 = vmul.f32 %v2612_v33, %v156_v36 }
 0x1b2   :  { %v161_v39 = vadd.f32 %v160_v38, %v159_v37 }
 0x1b4   :  { %2615 = vtanh.f32 %v161_v39 }
 0x1be   :  { %v2616_v40 = vpop.eup %2615 }
 0x1bf   :  { %v163_v42 = vmul.f32 %v2616_v40, %v158_v41  ;;  %v1554_v40 = vld [vmem:[%s3588_s0 + $0x8] sm:$0x3] }
 0x1c1   :  { %1889 = vmatmul.mubr.f32.vlgmr.msra.gmra.mrb[0].mxu1 %v163_v42 }
 0x1c2   :  { %2280 = vmatpush3.bf16.msra.mxu1 %v2835_v5  ;;  %1958 = vmatprep.mubr.msk.f32.mxu1 %vm2754_vm0, %v2755_v1 }
 0x1c3   :  { %2281 = vmatprep.subr.bf16.mxu1 %v2753_v0 }
 0x1c6   :  { %2283 = vmatpush3.bf16.msra.mxu1 %v2838_v7 }
 0x1c7   :  { %2284 = vmatprep.subr.bf16.mxu1 %v2753_v0 }
 0x1ca   :  { %2286 = vmatpush3.bf16.msra.mxu1 %v2844_v10 }
 0x1cb   :  { %2287 = vmatprep.subr.bf16.mxu1 %v2753_v0 }
 0x1ce   :  { %2289 = vmatpush3.bf16.msra.mxu1 %v2850_v13 }
 0x1cf   :  { %2290 = vmatprep.subr.bf16.mxu1 %v2753_v0 }
 0x1d2   :  { %2292 = vmatpush3.bf16.msra.mxu1 %v2856_v16 }
 0x1d3   :  { %2293 = vmatprep.subr.bf16.mxu1 %v2753_v0 }
 0x1d6   :  { %2295 = vmatpush3.bf16.msra.mxu1 %v2862_v19 }
 0x1d7   :  { %2296 = vmatprep.subr.bf16.mxu1 %v2753_v0 }
 0x1da   :  { %2298 = vmatpush3.bf16.msra.mxu1 %v2868_v22 }
 0x1db   :  { %2299 = vmatprep.subr.bf16.mxu1 %v2753_v0 }
 0x1de   :  { %2301 = vmatpush3.bf16.msra.mxu1 %v2874_v25 }
 0x1df   :  { %2326 = vmatprep.subr.bf16.mxu1 %v2753_v0 }
 0x294   :  { %v232_v44 = vpop.f32.mrb[0].mxu1 }
 0x295   :  { %v236_v45 = vadd.f32 %v1548_v43, %v232_v44  ;;  %v1890_v46 = vpop.f32.mrb[1].mxu1 }
 0x297   :  { %v1549_v47 = vmul.f32 -1.442695, %v236_v45  ;;  %2617 = vtanh.f32 %v236_v45 }
 0x299   :  { %2619 = vpow2.f32 %v1549_v47 }
 0x2a1   :  { %v2618_v48 = vpop.eup %2617 }
 0x2a2   :  { %246 = vrot.lane.b32.xlu0 %v2618_v48, %s2758_s11 }
 0x2a3   :  { %v2620_v49 = vpop.eup %2619 }
 0x2a4   :  { %v240_v50 = vadd.f32 1.0, %v2620_v49 }
 0x2a6   :  { %2621 = vrcp.f32 %v240_v50 }
 0x2b0   :  { %v2622_v51 = vpop.eup %2621 }
 0x2b1   :  { %244 = vrot.lane.b32.xlu1 %v2622_v51, %s2757_s10 }
 0x2b5   :  { %248 = vrot.lane.b32.xlu1 %v2622_v51, %s2756_s9 }
 0x314   :  { %v247_v52 = vpop.permute.xlu0 %246 }
 0x315   :  { %v251_v54 = vmul.f32 %v2622_v51, %v247_v52 }
 0x323   :  { %v245_v53 = vpop.permute.xlu1 %244 }
 0x324   :  { %v250_v55 = vmul.f32 %v245_v53, %v161_v39 }
 0x326   :  { %v252_v56 = vadd.f32 %v251_v54, %v250_v55 }
 0x327   :  { %v249_v58 = vpop.permute.xlu1 %248 }
 0x328   :  { %2623 = vtanh.f32 %v252_v56 }
 0x332   :  { %v2624_v57 = vpop.eup %2623 }
 0x333   :  { %v254_v59 = vmul.f32 %v2624_v57, %v249_v58 }
 0x335   :  { %1924 = vmatmul.mubr.f32.vlgmr.msra.gmra.mrb[2].mxu0 %v254_v59 }
 0x336   :  { %2304 = vmatpush3.bf16.msra.mxu0 %v2835_v5  ;;  %1993 = vmatprep.mubr.msk.f32.mxu0 %vm2754_vm0, %v2755_v1 }
 0x337   :  { %2305 = vmatprep.subr.bf16.mxu0 %v2753_v0 }
 0x33a   :  { %2307 = vmatpush3.bf16.msra.mxu0 %v2838_v7 }
 0x33b   :  { %2308 = vmatprep.subr.bf16.mxu0 %v2753_v0 }
 0x33e   :  { %2310 = vmatpush3.bf16.msra.mxu0 %v2844_v10 }
 0x33f   :  { %2311 = vmatprep.subr.bf16.mxu0 %v2753_v0 }
 0x342   :  { %2313 = vmatpush3.bf16.msra.mxu0 %v2850_v13 }
 0x343   :  { %2314 = vmatprep.subr.bf16.mxu0 %v2753_v0 }
 0x346   :  { %2316 = vmatpush3.bf16.msra.mxu0 %v2856_v16 }
 0x347   :  { %2317 = vmatprep.subr.bf16.mxu0 %v2753_v0 }
 0x34a   :  { %2319 = vmatpush3.bf16.msra.mxu0 %v2862_v19 }
 0x34b   :  { %2320 = vmatprep.subr.bf16.mxu0 %v2753_v0 }
 0x34e   :  { %2322 = vmatpush3.bf16.msra.mxu0 %v2868_v22 }
 0x34f   :  { %2323 = vmatprep.subr.bf16.mxu0 %v2753_v0 }
 0x352   :  { %2325 = vmatpush3.bf16.msra.mxu0 %v2874_v25 }
 0x353   :  { %2350 = vmatprep.subr.bf16.mxu0 %v2753_v0 }
 0x408   :  { %v323_v61 = vpop.f32.mrb[2].mxu0 }
 0x409   :  { %v327_v62 = vadd.f32 %v1550_v60, %v323_v61  ;;  %v1925_v63 = vpop.f32.mrb[3].mxu0 }
 0x40b   :  { %v1551_v2 = vmul.f32 -1.442695, %v327_v62  ;;  %2625 = vtanh.f32 %v327_v62 }
 0x40d   :  { %2627 = vpow2.f32 %v1551_v2 }
 0x415   :  { %v2626_v3 = vpop.eup %2625 }
 0x416   :  { %337 = vrot.lane.b32.xlu1 %v2626_v3, %s2758_s11 }
 0x417   :  { %v2628_v4 = vpop.eup %2627 }
 0x418   :  { %v331_v6 = vadd.f32 1.0, %v2628_v4  ;;  %v1558_v4 = vld [vmem:[%s3588_s0 + $0xc] sm:$0x3] }
 0x41a   :  { %2629 = vrcp.f32 %v331_v6 }
 0x424   :  { %v2630_v8 = vpop.eup %2629 }
 0x425   :  { %335 = vrot.lane.b32.xlu0 %v2630_v8, %s2757_s10 }
 0x429   :  { %339 = vrot.lane.b32.xlu0 %v2630_v8, %s2756_s9 }
 0x488   :  { %v338_v9 = vpop.permute.xlu1 %337 }
 0x489   :  { %v342_v12 = vmul.f32 %v2630_v8, %v338_v9 }
 0x497   :  { %v336_v11 = vpop.permute.xlu0 %335 }
 0x498   :  { %v341_v14 = vmul.f32 %v336_v11, %v252_v56 }
 0x49a   :  { %v343_v15 = vadd.f32 %v342_v12, %v341_v14 }
 0x49b   :  { %v340_v18 = vpop.permute.xlu0 %339 }
 0x49c   :  { %2631 = vtanh.f32 %v343_v15 }
 0x4a6   :  { %v2632_v17 = vpop.eup %2631 }
 0x4a7   :  { %v345_v20 = vmul.f32 %v2632_v17, %v340_v18 }
 0x4a9   :  { %1959 = vmatmul.mubr.f32.vlgmr.msra.gmra.mrb[2].mxu1 %v345_v20 }
 0x4aa   :  { %2328 = vmatpush3.bf16.msra.mxu1 %v2835_v5  ;;  %2028 = vmatprep.mubr.msk.f32.mxu1 %vm2754_vm0, %v2755_v1 }
 0x4ab   :  { %2329 = vmatprep.subr.bf16.mxu1 %v2753_v0 }
 0x4ae   :  { %2331 = vmatpush3.bf16.msra.mxu1 %v2838_v7 }
 0x4af   :  { %2332 = vmatprep.subr.bf16.mxu1 %v2753_v0 }
 0x4b2   :  { %2334 = vmatpush3.bf16.msra.mxu1 %v2844_v10 }
 0x4b3   :  { %2335 = vmatprep.subr.bf16.mxu1 %v2753_v0 }
 0x4b6   :  { %2337 = vmatpush3.bf16.msra.mxu1 %v2850_v13 }
 0x4b7   :  { %2338 = vmatprep.subr.bf16.mxu1 %v2753_v0 }
 0x4ba   :  { %2340 = vmatpush3.bf16.msra.mxu1 %v2856_v16 }
 0x4bb   :  { %2341 = vmatprep.subr.bf16.mxu1 %v2753_v0 }
 0x4be   :  { %2343 = vmatpush3.bf16.msra.mxu1 %v2862_v19 }
 0x4bf   :  { %2344 = vmatprep.subr.bf16.mxu1 %v2753_v0 }
 0x4c2   :  { %2346 = vmatpush3.bf16.msra.mxu1 %v2868_v22 }
 0x4c3   :  { %2347 = vmatprep.subr.bf16.mxu1 %v2753_v0 }
 0x4c6   :  { %2349 = vmatpush3.bf16.msra.mxu1 %v2874_v25 }
 0x4c7   :  { %2374 = vmatprep.subr.bf16.mxu1 %v2753_v0 }
 0x57c   :  { %v414_v23 = vpop.f32.mrb[2].mxu1 }
 0x57d   :  { %v418_v24 = vadd.f32 %v1552_v21, %v414_v23  ;;  %v1960_v26 = vpop.f32.mrb[3].mxu1 }
 0x57f   :  { %v1553_v27 = vmul.f32 -1.442695, %v418_v24  ;;  %2633 = vtanh.f32 %v418_v24 }
 0x581   :  { %2635 = vpow2.f32 %v1553_v27 }
 0x589   :  { %v2634_v28 = vpop.eup %2633 }
 0x58a   :  { %428 = vrot.lane.b32.xlu0 %v2634_v28, %s2758_s11 }
 0x58b   :  { %v2636_v29 = vpop.eup %2635 }
 0x58c   :  { %v422_v30 = vadd.f32 1.0, %v2636_v29  ;;  %v1560_v29 = vld [vmem:[%s3588_s0 + $0xe] sm:$0x3] }
 0x58e   :  { %2637 = vrcp.f32 %v422_v30  ;;  %v801_v30 = vld [vmem:[#allocation5] sm:$0xff] }
 0x598   :  { %v2638_v31 = vpop.eup %2637 }
 0x599   :  { %426 = vrot.lane.b32.xlu1 %v2638_v31, %s2757_s10 }
 0x59d   :  { %430 = vrot.lane.b32.xlu1 %v2638_v31, %s2756_s9 }
 0x5fc   :  { %v429_v32 = vpop.permute.xlu0 %428 }
 0x5fd   :  { %v433_v34 = vmul.f32 %v2638_v31, %v429_v32  ;;  %v802_v31 = vld [vmem:[#allocation5 + $0x8] sm:$0xff] }
 0x60b   :  { %v427_v33 = vpop.permute.xlu1 %426 }
 0x60c   :  { %v432_v35 = vmul.f32 %v427_v33, %v343_v15  ;;  %v2399_v33 = vpack.c.bf16 %v802_v31, %v801_v30  ;;  %v935_v30 = vld [vmem:[%s3592_s4 + $0x140] sm:$0xff] }
 0x60e   :  { %v434_v36 = vadd.f32 %v433_v34, %v432_v35 }
 0x60f   :  { %v431_v38 = vpop.permute.xlu1 %430 }
 0x610   :  { %2639 = vtanh.f32 %v434_v36 }
 0x61a   :  { %v2640_v37 = vpop.eup %2639 }
 0x61b   :  { %v436_v39 = vmul.f32 %v2640_v37, %v431_v38  ;;  %v804_v37 = vld [vmem:[#allocation5 + $0x18] sm:$0xff] }
 0x61d   :  { %1994 = vmatmul.mubr.f32.vlgmr.msra.gmra.mrb[4].mxu0 %v436_v39 }
 0x61e   :  { %2352 = vmatpush3.bf16.msra.mxu0 %v2835_v5  ;;  %2063 = vmatprep.mubr.msk.f32.mxu0 %vm2754_vm0, %v2755_v1 }
 0x61f   :  { %2353 = vmatprep.subr.bf16.mxu0 %v2753_v0 }
 0x622   :  { %2355 = vmatpush3.bf16.msra.mxu0 %v2838_v7 }
 0x623   :  { %2356 = vmatprep.subr.bf16.mxu0 %v2753_v0 }
 0x626   :  { %2358 = vmatpush3.bf16.msra.mxu0 %v2844_v10 }
 0x627   :  { %2359 = vmatprep.subr.bf16.mxu0 %v2753_v0 }
 0x62a   :  { %2361 = vmatpush3.bf16.msra.mxu0 %v2850_v13 }
 0x62b   :  { %2362 = vmatprep.subr.bf16.mxu0 %v2753_v0 }
 0x62e   :  { %2364 = vmatpush3.bf16.msra.mxu0 %v2856_v16 }
 0x62f   :  { %2365 = vmatprep.subr.bf16.mxu0 %v2753_v0 }
 0x632   :  { %2367 = vmatpush3.bf16.msra.mxu0 %v2862_v19 }
 0x633   :  { %2368 = vmatprep.subr.bf16.mxu0 %v2753_v0 }
 0x636   :  { %2370 = vmatpush3.bf16.msra.mxu0 %v2868_v22 }
 0x637   :  { %2371 = vmatprep.subr.bf16.mxu0 %v2753_v0 }
 0x63a   :  { %2373 = vmatpush3.bf16.msra.mxu0 %v2874_v25 }
 0x63b   :  { %2398 = vmatprep.subr.bf16.mxu0 %v2753_v0 }
 0x6f0   :  { %v505_v41 = vpop.f32.mrb[4].mxu0 }
 0x6f1   :  { %v509_v42 = vadd.f32 %v1554_v40, %v505_v41  ;;  %v1995_v43 = vpop.f32.mrb[5].mxu0  ;;  %v805_v40 = vld [vmem:[#allocation5 + $0x20] sm:$0xff]  ;;  %v806_v41 = vld [vmem:[#allocation5 + $0x28] sm:$0xff] }
 0x6f2   :  { %v807_v43 = vld [vmem:[#allocation5 + $0x30] sm:$0xff] }
 0x6f3   :  { %v1555_v44 = vmul.f32 -1.442695, %v509_v42  ;;  %2641 = vtanh.f32 %v509_v42  ;;  %v2405_v42 = vpack.c.bf16 %v806_v41, %v805_v40  ;;  %v956_v40 = vld [vmem:[%s3592_s4 + $0x1e8] sm:$0xff]  ;;  %v961_v41 = vld [vmem:[%s3592_s4 + $0x210] sm:$0xff] }
 0x6f5   :  { %2643 = vpow2.f32 %v1555_v44  ;;  %v808_v44 = vld [vmem:[#allocation5 + $0x38] sm:$0xff] }
 0x6fd   :  { %v2642_v45 = vpop.eup %2641 }
 0x6fe   :  { %519 = vrot.lane.b32.xlu1 %v2642_v45, %s2758_s11  ;;  %v2408_v45 = vpack.c.bf16 %v808_v44, %v807_v43  ;;  %v2446_v43 = vpack.c.bf16 %v961_v41, %v956_v40  ;;  %v960_v44 = vld [vmem:[%s3592_s4 + $0x208] sm:$0xff] }
 0x6ff   :  { %v2644_v46 = vpop.eup %2643  ;;  %v972_v40 = vld [vmem:[%s3592_s4 + $0x268] sm:$0xff] }
 0x700   :  { %v513_v47 = vadd.f32 1.0, %v2644_v46 }
 0x702   :  { %2645 = vrcp.f32 %v513_v47 }
 0x70c   :  { %v2646_v48 = vpop.eup %2645 }
 0x70d   :  { %517 = vrot.lane.b32.xlu0 %v2646_v48, %s2757_s10 }
 0x711   :  { %521 = vrot.lane.b32.xlu0 %v2646_v48, %s2756_s9 }
 0x770   :  { %v520_v49 = vpop.permute.xlu1 %519 }
 0x771   :  { %v524_v51 = vmul.f32 %v2646_v48, %v520_v49  ;;  %v809_v48 = vld [vmem:[#allocation5 + $0x40] sm:$0xff]  ;;  %v810_v49 = vld [vmem:[#allocation5 + $0x48] sm:$0xff] }
 0x77f   :  { %v518_v50 = vpop.permute.xlu0 %517 }
 0x780   :  { %v523_v52 = vmul.f32 %v518_v50, %v434_v36  ;;  %v803_v36 = vld [vmem:[#allocation5 + $0x10] sm:$0xff] }
 0x781   :  { %v2402_v38 = vpack.c.bf16 %v804_v37, %v803_v36  ;;  %v945_v36 = vld [vmem:[%s3592_s4 + $0x190] sm:$0xff] }
 0x782   :  { %v525_v53 = vadd.f32 %v524_v51, %v523_v52  ;;  %v2411_v51 = vpack.c.bf16 %v810_v49, %v809_v48  ;;  %v811_v52 = vld [vmem:[#allocation5 + $0x50] sm:$0xff] }
 0x783   :  { %v522_v55 = vpop.permute.xlu0 %521 }
 0x784   :  { %2647 = vtanh.f32 %v525_v53 }
 0x78e   :  { %v2648_v54 = vpop.eup %2647 }
 0x78f   :  { %v527_v56 = vmul.f32 %v2648_v54, %v522_v55  ;;  %v813_v55 = vld [vmem:[#allocation5 + $0x60] sm:$0xff] }
 0x791   :  { %2029 = vmatmul.mubr.f32.vlgmr.msra.gmra.mrb[4].mxu1 %v527_v56  ;;  %v814_v56 = vld [vmem:[#allocation5 + $0x68] sm:$0xff] }
 0x792   :  { %2376 = vmatpush3.bf16.msra.mxu1 %v2835_v5  ;;  %2098 = vmatprep.mubr.msk.f32.mxu1 %vm2754_vm0, %v2755_v1  ;;  %v1556_v5 = vld [vmem:[%s3588_s0 + $0xa] sm:$0x3] }
 0x793   :  { %2377 = vmatprep.subr.bf16.mxu1 %v2753_v0 }
 0x796   :  { %2379 = vmatpush3.bf16.msra.mxu1 %v2838_v7 }
 0x797   :  { %2380 = vmatprep.subr.bf16.mxu1 %v2753_v0 }
 0x79a   :  { %2382 = vmatpush3.bf16.msra.mxu1 %v2844_v10 }
 0x79b   :  { %2383 = vmatprep.subr.bf16.mxu1 %v2753_v0 }
 0x79e   :  { %2385 = vmatpush3.bf16.msra.mxu1 %v2850_v13 }
 0x79f   :  { %2386 = vmatprep.subr.bf16.mxu1 %v2753_v0 }
 0x7a2   :  { %2388 = vmatpush3.bf16.msra.mxu1 %v2856_v16 }
 0x7a3   :  { %2389 = vmatprep.subr.bf16.mxu1 %v2753_v0 }
 0x7a6   :  { %2391 = vmatpush3.bf16.msra.mxu1 %v2862_v19 }
 0x7a7   :  { %2392 = vmatprep.subr.bf16.mxu1 %v2753_v0 }
 0x7aa   :  { %2394 = vmatpush3.bf16.msra.mxu1 %v2868_v22 }
 0x7ab   :  { %2395 = vmatprep.subr.bf16.mxu1 %v2753_v0 }
 0x7ae   :  { %2397 = vmatpush3.bf16.msra.mxu1 %v2874_v25 }
 0x864   :  { %v596_v7 = vpop.f32.mrb[4].mxu1 }
 0x865   :  { %v600_v10 = vadd.f32 %v1556_v5, %v596_v7  ;;  %v2030_v13 = vpop.f32.mrb[5].mxu1  ;;  %v2417_v5 = vpack.c.bf16 %v814_v56, %v813_v55  ;;  %v815_v7 = vld [vmem:[#allocation5 + $0x70] sm:$0xff] }
 0x867   :  { %v1557_v16 = vmul.f32 -1.442695, %v600_v10  ;;  %2649 = vtanh.f32 %v600_v10  ;;  %v816_v10 = vld [vmem:[#allocation5 + $0x78] sm:$0xff] }
 0x869   :  { %2651 = vpow2.f32 %v1557_v16  ;;  %v2420_v16 = vpack.c.bf16 %v816_v10, %v815_v7  ;;  %v907_v10 = vld [vmem:[%s3592_s4 + $0x60] sm:$0xff] }
 0x871   :  { %v2650_v57 = vpop.eup %2649 }
 0x872   :  { %610 = vrot.lane.b32.xlu0 %v2650_v57, %s2758_s11  ;;  %v896_v57 = vld [vmem:[%s3592_s4 + $0x8] sm:$0xff] }
 0x873   :  { %v2652_v19 = vpop.eup %2651 }
 0x874   :  { %v604_v58 = vadd.f32 1.0, %v2652_v19  ;;  %v901_v19 = vld [vmem:[%s3592_s4 + $0x30] sm:$0xff] }
 0x876   :  { %2653 = vrcp.f32 %v604_v58  ;;  %v895_v58 = vld [vmem:[%s3592_s4] sm:$0xff] }
 0x880   :  { %v2654_v22 = vpop.eup %2653 }
 0x881   :  { %608 = vrot.lane.b32.xlu1 %v2654_v22, %s2757_s10 }
 0x885   :  { %612 = vrot.lane.b32.xlu1 %v2654_v22, %s2756_s9 }
 0x8e4   :  { %v611_v25 = vpop.permute.xlu0 %610 }
 0x8e5   :  { %v615_v60 = vmul.f32 %v2654_v22, %v611_v25  ;;  %v2422_v22 = vpack.c.bf16 %v901_v19, %v896_v57  ;;  %v900_v25 = vld [vmem:[%s3592_s4 + $0x28] sm:$0xff]  ;;  %v923_v57 = vld [vmem:[%s3592_s4 + $0xe0] sm:$0xff] }
 0x8e7   :  { %2423 = vmatprep.subr.bf16.mxu1 %v2422_v22  ;;  %v917_v22 = vld [vmem:[%s3592_s4 + $0xb0] sm:$0xff] }
 0x8f3   :  { %v609_v59 = vpop.permute.xlu1 %608 }
 0x8f4   :  { %v614_v61 = vmul.f32 %v609_v59, %v525_v53  ;;  %v812_v53 = vld [vmem:[#allocation5 + $0x58] sm:$0xff] }
 0x8f5   :  { %v2414_v54 = vpack.c.bf16 %v812_v53, %v811_v52  ;;  %v898_v59 = vld [vmem:[%s3592_s4 + $0x18] sm:$0xff]  ;;  %v908_v53 = vld [vmem:[%s3592_s4 + $0x68] sm:$0xff] }
 0x8f6   :  { %v616_v62 = vadd.f32 %v615_v60, %v614_v61  ;;  %v903_v60 = vld [vmem:[%s3592_s4 + $0x40] sm:$0xff]  ;;  %v2424_v61 = vpack.c.bf16 %v900_v25, %v895_v58  ;;  %v902_v52 = vld [vmem:[%s3592_s4 + $0x38] sm:$0xff] }
 0x8f7   :  { %v613_v2 = vpop.permute.xlu1 %612  ;;  %v922_v25 = vld [vmem:[%s3592_s4 + $0xd8] sm:$0xff] }
 0x8f8   :  { %2655 = vtanh.f32 %v616_v62 }
 0x902   :  { %v2656_v63 = vpop.eup %2655 }
 0x903   :  { %v618_v3 = vmul.f32 %v2656_v63, %v613_v2  ;;  %v906_v63 = vld [vmem:[%s3592_s4 + $0x58] sm:$0xff]  ;;  %v911_v2 = vld [vmem:[%s3592_s4 + $0x80] sm:$0xff] }
 0x905   :  { %2064 = vmatmul.mubr.f32.vlgmr.msra.gmra.mrb[6].mxu0 %v618_v3  ;;  %v905_v3 = vld [vmem:[%s3592_s4 + $0x50] sm:$0xff] }
 0x906   :  { %2133 = vmatprep.mubr.msk.f32.mxu0 %vm2754_vm0, %v2755_v1  ;;  %2400 = vmatpush3.bf16.msra.mxu0 %v2399_v33 }
 0x907   :  { %2401 = vmatprep.subr.bf16.mxu0 %v2753_v0 }
 0x90a   :  { %2403 = vmatpush3.bf16.msra.mxu0 %v2402_v38  ;;  %v950_v38 = vld [vmem:[%s3592_s4 + $0x1b8] sm:$0xff] }
 0x90b   :  { %2404 = vmatprep.subr.bf16.mxu0 %v2753_v0 }
 0x90e   :  { %2406 = vmatpush3.bf16.msra.mxu0 %v2405_v42  ;;  %v955_v42 = vld [vmem:[%s3592_s4 + $0x1e0] sm:$0xff] }
 0x90f   :  { %2407 = vmatprep.subr.bf16.mxu0 %v2753_v0 }
 0x912   :  { %2409 = vmatpush3.bf16.msra.mxu0 %v2408_v45  ;;  %v2448_v45 = vpack.c.bf16 %v960_v44, %v955_v42  ;;  %v1236_v44 = vld [vmem:[%s3594_s6 + $0x88] sm:$0xff] }
 0x913   :  { %2410 = vmatprep.subr.bf16.mxu0 %v2753_v0 }
 0x916   :  { %2412 = vmatpush3.bf16.msra.mxu0 %v2411_v51  ;;  %v897_v51 = vld [vmem:[%s3592_s4 + $0x10] sm:$0xff] }
 0x917   :  { %2413 = vmatprep.subr.bf16.mxu0 %v2753_v0  ;;  %v2456_v56 = vpack.c.bf16 %v902_v52, %v897_v51  ;;  %v1220_v51 = vld [vmem:[%s3594_s6 + $0x8] sm:$0xff] }
 0x91a   :  { %2415 = vmatpush3.bf16.msra.mxu0 %v2414_v54  ;;  %v913_v54 = vld [vmem:[%s3592_s4 + $0x90] sm:$0xff] }
 0x91b   :  { %2416 = vmatprep.subr.bf16.mxu0 %v2753_v0  ;;  %v2458_v7 = vpack.c.bf16 %v913_v54, %v908_v53  ;;  %v1237_v54 = vld [vmem:[%s3594_s6 + $0x90] sm:$0xff] }
 0x91e   :  { %2418 = vmatpush3.bf16.msra.mxu0 %v2417_v5 }
 0x91f   :  { %2419 = vmatprep.subr.bf16.mxu0 %v2753_v0 }
 0x922   :  { %2421 = vmatpush3.bf16.msra.mxu0 %v2420_v16  ;;  %v918_v16 = vld [vmem:[%s3592_s4 + $0xb8] sm:$0xff] }
 0x923   :  { %v2462_v58 = vpack.c.bf16 %v923_v57, %v918_v16  ;;  %v1221_v16 = vld [vmem:[%s3594_s6 + $0x10] sm:$0xff]  ;;  %v1222_v57 = vld [vmem:[%s3594_s6 + $0x18] sm:$0xff] }
 0x9d8   :  { %v687_v6 = vpop.f32.mrb[6].mxu0 }
 0x9d9   :  { %v691_v8 = vadd.f32 %v1558_v4, %v687_v6  ;;  %v2065_v9 = vpop.f32.mrb[7].mxu0  ;;  %v910_v4 = vld [vmem:[%s3592_s4 + $0x78] sm:$0xff]  ;;  %v2426_v6 = vpack.c.bf16 %v911_v2, %v906_v63  ;;  %v927_v63 = vld [vmem:[%s3592_s4 + $0x100] sm:$0xff]  ;;  %v932_v2 = vld [vmem:[%s3592_s4 + $0x128] sm:$0xff] }
 0x9da   :  { %v916_v9 = vld [vmem:[%s3592_s4 + $0xa8] sm:$0xff] }
 0x9db   :  { %v1559_v11 = vmul.f32 -1.442695, %v691_v8  ;;  %2657 = vtanh.f32 %v691_v8  ;;  %v2428_v8 = vpack.c.bf16 %v910_v4, %v905_v3  ;;  %v938_v3 = vld [vmem:[%s3592_s4 + $0x158] sm:$0xff]  ;;  %v943_v4 = vld [vmem:[%s3592_s4 + $0x180] sm:$0xff] }
 0x9dd   :  { %2659 = vpow2.f32 %v1559_v11  ;;  %v921_v11 = vld [vmem:[%s3592_s4 + $0xd0] sm:$0xff] }
 0x9e5   :  { %v2658_v12 = vpop.eup %2657 }
 0x9e6   :  { %701 = vrot.lane.b32.xlu1 %v2658_v12, %s2758_s11  ;;  %v2430_v12 = vpack.c.bf16 %v921_v11, %v916_v9  ;;  %v937_v9 = vld [vmem:[%s3592_s4 + $0x150] sm:$0xff]  ;;  %v942_v11 = vld [vmem:[%s3592_s4 + $0x178] sm:$0xff] }
 0x9e7   :  { %v2660_v14 = vpop.eup %2659 }
 0x9e8   :  { %v695_v15 = vadd.f32 1.0, %v2660_v14  ;;  %v915_v14 = vld [vmem:[%s3592_s4 + $0xa0] sm:$0xff] }
 0x9ea   :  { %2661 = vrcp.f32 %v695_v15  ;;  %v920_v15 = vld [vmem:[%s3592_s4 + $0xc8] sm:$0xff] }
 0x9f4   :  { %v2662_v17 = vpop.eup %2661 }
 0x9f5   :  { %699 = vrot.lane.b32.xlu0 %v2662_v17, %s2757_s10 }
 0x9f9   :  { %703 = vrot.lane.b32.xlu0 %v2662_v17, %s2756_s9 }
 0xa58   :  { %v702_v18 = vpop.permute.xlu1 %701 }
 0xa59   :  { %v706_v21 = vmul.f32 %v2662_v17, %v702_v18  ;;  %v2432_v17 = vpack.c.bf16 %v920_v15, %v915_v14  ;;  %v926_v18 = vld [vmem:[%s3592_s4 + $0xf8] sm:$0xff]  ;;  %v953_v14 = vld [vmem:[%s3592_s4 + $0x1d0] sm:$0xff]  ;;  %v2472_v15 = vpack.c.bf16 %v942_v11, %v937_v9 }
 0xa67   :  { %v700_v20 = vpop.permute.xlu0 %699 }
 0xa68   :  { %v705_v23 = vmul.f32 %v700_v20, %v616_v62  ;;  %v2454_v62 = vpack.c.bf16 %v903_v60, %v898_v59  ;;  %v931_v20 = vld [vmem:[%s3592_s4 + $0x120] sm:$0xff]  ;;  %v928_v59 = vld [vmem:[%s3592_s4 + $0x108] sm:$0xff]  ;;  %v933_v60 = vld [vmem:[%s3592_s4 + $0x130] sm:$0xff] }
 0xa6a   :  { %v3035_v24 = vadd.f32 %v706_v21, %v705_v23  ;;  %2455 = vmatprep.subr.bf16.mxu0 %v2454_v62  ;;  %v925_v21 = vld [vmem:[%s3592_s4 + $0xf0] sm:$0xff]  ;;  %v2434_v23 = vpack.c.bf16 %v931_v20, %v926_v18  ;;  %v2466_v62 = vpack.c.bf16 %v933_v60, %v928_v59  ;;  %v947_v18 = vld [vmem:[%s3592_s4 + $0x1a0] sm:$0xff]  ;;  %v952_v20 = vld [vmem:[%s3592_s4 + $0x1c8] sm:$0xff]  ;;  %v2516_v60 = vpack.c.bf16 %v1222_v57, %v1221_v16 }
 0xa6b   :  { %v704_v27 = vpop.permute.xlu0 %703  ;;  %v924_v59 = vld [vmem:[%s3592_s4 + $0xe8] sm:$0xff]  ;;  %v1253_v16 = vld [vmem:[%s3594_s6 + $0x110] sm:$0xff]  ;;  %v1254_v57 = vld [vmem:[%s3594_s6 + $0x118] sm:$0xff] }
 0xa6c   :  { %2663 = vtanh.f32 %v3035_v24 }
 0xa76   :  { %v2664_v26 = vpop.eup %2663 }
 0xa77   :  { %v709_v28 = vmul.f32 %v2664_v26, %v704_v27  ;;  %v930_v26 = vld [vmem:[%s3592_s4 + $0x118] sm:$0xff] }
 0xa78   :  { %v2436_v27 = vpack.c.bf16 %v930_v26, %v925_v21  ;;  %v958_v21 = vld [vmem:[%s3592_s4 + $0x1f8] sm:$0xff]  ;;  %v2476_v26 = vpack.c.bf16 %v952_v20, %v947_v18  ;;  %v939_v20 = vld [vmem:[%s3592_s4 + $0x160] sm:$0xff] }
 0xa79   :  { %2099 = vmatmul.mubr.f32.vlgmr.msra.gmra.mrb[6].mxu1 %v709_v28  ;;  %v936_v28 = vld [vmem:[%s3592_s4 + $0x148] sm:$0xff] }
 0xa7a   :  { %1066 = vmatprep.mubr.f32.mxu1 %v2755_v1  ;;  %2425 = vmatpush1.bf16.msra.mxu1 %v2424_v61  ;;  %v2464_v61 = vpack.c.bf16 %v922_v25, %v917_v22  ;;  %v919_v25 = vld [vmem:[%s3592_s4 + $0xc0] sm:$0xff] }
 0xa7b   :  { %2427 = vmatprep.subr.bf16.mxu1 %v2426_v6  ;;  %v2468_v6 = vpack.c.bf16 %v932_v2, %v927_v63  ;;  %v1224_v63 = vld [vmem:[%s3594_s6 + $0x28] sm:$0xff]  ;;  %v1241_v2 = vld [vmem:[%s3594_s6 + $0xb0] sm:$0xff] }
 0xa7e   :  { %2429 = vmatpush1.bf16.msra.mxu1 %v2428_v8  ;;  %v2470_v8 = vpack.c.bf16 %v943_v4, %v938_v3  ;;  %v1242_v3 = vld [vmem:[%s3594_s6 + $0xb8] sm:$0xff]  ;;  %v2493_v4 = vpack.c.bf16 %v924_v59, %v919_v25  ;;  %v1255_v59 = vld [vmem:[%s3594_s6 + $0x120] sm:$0xff] }
 0xa7f   :  { %2431 = vmatprep.subr.bf16.mxu1 %v2430_v12  ;;  %v948_v12 = vld [vmem:[%s3592_s4 + $0x1a8] sm:$0xff]  ;;  %v2522_v11 = vpack.c.bf16 %v1242_v3, %v1241_v2  ;;  %v1257_v2 = vld [vmem:[%s3594_s6 + $0x130] sm:$0xff]  ;;  %v1258_v3 = vld [vmem:[%s3594_s6 + $0x138] sm:$0xff] }
 0xa82   :  { %2433 = vmatpush1.bf16.msra.mxu1 %v2432_v17  ;;  %v2474_v17 = vpack.c.bf16 %v953_v14, %v948_v12  ;;  %v1225_v12 = vld [vmem:[%s3594_s6 + $0x30] sm:$0xff]  ;;  %v1226_v14 = vld [vmem:[%s3594_s6 + $0x38] sm:$0xff] }
 0xa83   :  { %2435 = vmatprep.subr.bf16.mxu1 %v2434_v23  ;;  %v963_v23 = vld [vmem:[%s3592_s4 + $0x220] sm:$0xff] }
 0xa86   :  { %2437 = vmatpush1.bf16.msra.mxu1 %v2436_v27  ;;  %v2478_v27 = vpack.c.bf16 %v963_v23, %v958_v21  ;;  %v944_v21 = vld [vmem:[%s3592_s4 + $0x188] sm:$0xff]  ;;  %v2524_v23 = vpack.c.bf16 %v1226_v14, %v1225_v12  ;;  %v1277_v14 = vld [vmem:[%s3594_s6 + $0x1d0] sm:$0xff] }
 0xa87   :  { %v1260_v12 = vld [vmem:[%s3594_s6 + $0x148] sm:$0xff] }
 0xb4c   :  { %v778_v32 = vpop.f32.mrb[6].mxu1 }
 0xb4d   :  { %v782_v34 = vadd.f32 %v1560_v29, %v778_v32  ;;  %v2100_v35 = vpop.f32.mrb[7].mxu1  ;;  %v941_v29 = vld [vmem:[%s3592_s4 + $0x170] sm:$0xff]  ;;  %v940_v32 = vld [vmem:[%s3592_s4 + $0x168] sm:$0xff] }
 0xb4e   :  { %v2438_v31 = vpack.c.bf16 %v941_v29, %v936_v28  ;;  %v2440_v33 = vpack.c.bf16 %v940_v32, %v935_v30  ;;  %v951_v35 = vld [vmem:[%s3592_s4 + $0x1c0] sm:$0xff]  ;;  %v957_v28 = vld [vmem:[%s3592_s4 + $0x1f0] sm:$0xff]  ;;  %v962_v29 = vld [vmem:[%s3592_s4 + $0x218] sm:$0xff] }
 0xb4f   :  { %v1561_v39 = vmul.f32 -1.442695, %v782_v34  ;;  %2665 = vtanh.f32 %v782_v34  ;;  %v946_v34 = vld [vmem:[%s3592_s4 + $0x198] sm:$0xff]  ;;  %v2480_v30 = vpack.c.bf16 %v962_v29, %v957_v28  ;;  %v971_v32 = vld [vmem:[%s3592_s4 + $0x260] sm:$0xff]  ;;  %v1228_v28 = vld [vmem:[%s3594_s6 + $0x48] sm:$0xff] }
 0xb50   :  { %2439 = vmatprep.subr.bf16.mxu1 %v2438_v31  ;;  %v2442_v37 = vpack.c.bf16 %v951_v35, %v946_v34  ;;  %v966_v31 = vld [vmem:[%s3592_s4 + $0x238] sm:$0xff]  ;;  %v965_v34 = vld [vmem:[%s3592_s4 + $0x230] sm:$0xff] }
 0xb51   :  { %2667 = vpow2.f32 %v1561_v39  ;;  %2441 = vmatpush1.bf16.msra.mxu1 %v2440_v33  ;;  %v2444_v39 = vpack.c.bf16 %v950_v38, %v945_v36  ;;  %v2450_v33 = vpack.c.bf16 %v971_v32, %v966_v31  ;;  %v970_v35 = vld [vmem:[%s3592_s4 + $0x258] sm:$0xff]  ;;  %v968_v36 = vld [vmem:[%s3592_s4 + $0x248] sm:$0xff]  ;;  %v973_v38 = vld [vmem:[%s3592_s4 + $0x270] sm:$0xff]  ;;  %v2499_v31 = vpack.c.bf16 %v944_v21, %v939_v20 }
 0xb52   :  { %2443 = vmatprep.subr.bf16.mxu1 %v2442_v37  ;;  %v2452_v37 = vpack.c.bf16 %v970_v35, %v965_v34  ;;  %v2482_v41 = vpack.c.bf16 %v973_v38, %v968_v36  ;;  %v1245_v29 = vld [vmem:[%s3594_s6 + $0xd0] sm:$0xff]  ;;  %v1247_v38 = vld [vmem:[%s3594_s6 + $0xe0] sm:$0xff]  ;;  %v1262_v21 = vld [vmem:[%s3594_s6 + $0x158] sm:$0xff] }
 0xb53   :  { %v949_v32 = vld [vmem:[%s3592_s4 + $0x1b0] sm:$0xff] }
 0xb54   :  { %v1229_v36 = vld [vmem:[%s3594_s6 + $0x50] sm:$0xff] }
 0xb55   :  { %2445 = vmatpush1.bf16.msra.mxu1 %v2444_v39  ;;  %v967_v39 = vld [vmem:[%s3592_s4 + $0x240] sm:$0xff]  ;;  %v1261_v20 = vld [vmem:[%s3594_s6 + $0x150] sm:$0xff] }
 0xb56   :  { %2447 = vmatprep.subr.bf16.mxu1 %v2446_v43  ;;  %v2484_v42 = vpack.c.bf16 %v972_v40, %v967_v39  ;;  %v1235_v43 = vld [vmem:[%s3594_s6 + $0x80] sm:$0xff]  ;;  %v1248_v39 = vld [vmem:[%s3594_s6 + $0xe8] sm:$0xff] }
 0xb59   :  { %v2666_v46 = vpop.eup %2665  ;;  %2449 = vmatpush1.bf16.msra.mxu1 %v2448_v45  ;;  %v2510_v45 = vpack.c.bf16 %v1236_v44, %v1235_v43  ;;  %v2534_v44 = vpack.c.bf16 %v1248_v39, %v1247_v38  ;;  %v1282_v39 = vld [vmem:[%s3594_s6 + $0x1f8] sm:$0xff] }
 0xb5a   :  { %792 = vrot.lane.b32.xlu0 %v2666_v46, %s2758_s11  ;;  %2451 = vmatprep.subr.bf16.mxu1 %v2450_v33  ;;  %v954_v33 = vld [vmem:[%s3592_s4 + $0x1d8] sm:$0xff] }
 0xb5b   :  { %v2668_v47 = vpop.eup %2667  ;;  %v2502_v40 = vpack.c.bf16 %v954_v33, %v949_v32  ;;  %v1249_v32 = vld [vmem:[%s3594_s6 + $0xf0] sm:$0xff]  ;;  %v1250_v33 = vld [vmem:[%s3594_s6 + $0xf8] sm:$0xff] }
 0xb5c   :  { %v786_v50 = vadd.f32 1.0, %v2668_v47 }
 0xb5d   :  { %2453 = vmatpush1.bf16.msra.mxu1 %v2452_v37  ;;  %v1230_v37 = vld [vmem:[%s3594_s6 + $0x58] sm:$0xff] }
 0xb5e   :  { %2669 = vrcp.f32 %v786_v50  ;;  %2486 = vmatprep.subr.bf16.mxu1 %v2753_v0  ;;  %v2532_v43 = vpack.c.bf16 %v1230_v37, %v1229_v36  ;;  %v1234_v36 = vld [vmem:[%s3594_s6 + $0x78] sm:$0xff]  ;;  %v1281_v37 = vld [vmem:[%s3594_s6 + $0x1f0] sm:$0xff] }
 0xb68   :  { %v3050_v13 = vpop.eup %2669 }
 0xb69   :  { %790 = vrot.lane.b32.xlu1 %v3050_v13, %s2757_s10 }
 0xb6d   :  { %794 = vrot.lane.b32.xlu1 %v3050_v13, %s2756_s9 }
 0xbcc   :  { %v793_v46 = vpop.permute.xlu0 %792 }
 0xbcd   :  { %v797_v48 = vmul.f32 %v3050_v13, %v793_v46  ;;  %v912_v13 = vld [vmem:[%s3592_s4 + $0x88] sm:$0xff]  ;;  %v1562_v46 = vld [vmem:[%s3591_s3] ss:$0 sm:$0xff] }
 0xbce   :  { %v2460_v19 = vpack.c.bf16 %v912_v13, %v907_v10 }
 0xbdb   :  { %v791_v47 = vpop.permute.xlu1 %790 }
 0xbdc   :  { %v796_v49 = vmul.f32 %v791_v47, %v3035_v24  ;;  %v899_v47 = vld [vmem:[%s3592_s4 + $0x20] sm:$0xff] }
 0xbde   :  { %v798_v50 = vadd.f32 %v797_v48, %v796_v49  ;;  %v904_v48 = vld [vmem:[%s3592_s4 + $0x48] sm:$0xff] }
 0xbdf   :  { %v795_v24 = vpop.permute.xlu1 %794 }
 0xbe0   :  { %2671 = vtanh.f32 %v798_v50  ;;  %v1219_v50 = vld [vmem:[%s3594_s6] sm:$0xff] }
 0xbe1   :  { %v2512_v10 = vpack.c.bf16 %v1220_v51, %v1219_v50  ;;  %v1267_v51 = vld [vmem:[%s3594_s6 + $0x180] sm:$0xff] }
 0xbea   :  { %v2672_v55 = vpop.eup %2671 }
 0xbeb   :  { %v800_v5 = vmul.f32 %v2672_v55, %v795_v24  ;;  %v1238_v55 = vld [vmem:[%s3594_s6 + $0x98] sm:$0xff]  ;;  %v2487_v24 = vpack.c.bf16 %v904_v48, %v899_v47  ;;  %v969_v48 = vld [vmem:[%s3592_s4 + $0x250] sm:$0xff] }
 0xbec   :  { %v2514_v13 = vpack.c.bf16 %v1238_v55, %v1237_v54  ;;  %v1251_v55 = vld [vmem:[%s3594_s6 + $0x100] sm:$0xff] }
 0xbed   :  { %2134 = vmatmul.mubr.f32.vlgmr.msra.gmra.mrb[8].mxu0 %v800_v5  ;;  %v909_v5 = vld [vmem:[%s3592_s4 + $0x70] sm:$0xff] }
 0xbee   :  { %2457 = vmatpush1.bf16.msra.mxu0 %v2456_v56  ;;  %1137 = vmatprep.mubr.f32.mxu0 %v2755_v1 }
 0xbef   :  { %2459 = vmatprep.subr.bf16.mxu0 %v2458_v7  ;;  %v914_v7 = vld [vmem:[%s3592_s4 + $0x98] sm:$0xff] }
 0xbf0   :  { %v2490_v22 = vpack.c.bf16 %v914_v7, %v909_v5  ;;  %v1269_v5 = vld [vmem:[%s3594_s6 + $0x190] sm:$0xff]  ;;  %v1270_v7 = vld [vmem:[%s3594_s6 + $0x198] sm:$0xff] }
 0xbf2   :  { %2461 = vmatpush1.bf16.msra.mxu0 %v2460_v19  ;;  %v1239_v19 = vld [vmem:[%s3594_s6 + $0xa0] sm:$0xff] }
 0xbf3   :  { %2463 = vmatprep.subr.bf16.mxu0 %v2462_v58  ;;  %v1240_v58 = vld [vmem:[%s3594_s6 + $0xa8] sm:$0xff] }
 0xbf6   :  { %2465 = vmatpush1.bf16.msra.mxu0 %v2464_v61  ;;  %v2518_v61 = vpack.c.bf16 %v1240_v58, %v1239_v19  ;;  %v1271_v19 = vld [vmem:[%s3594_s6 + $0x1a0] sm:$0xff]  ;;  %v1272_v58 = vld [vmem:[%s3594_s6 + $0x1a8] sm:$0xff] }
 0xbf7   :  { %2467 = vmatprep.subr.bf16.mxu0 %v2466_v62  ;;  %v1223_v62 = vld [vmem:[%s3594_s6 + $0x20] sm:$0xff]  ;;  %v2550_v25 = vpack.c.bf16 %v1272_v58, %v1271_v19 }
 0xbf8   :  { %v2520_v9 = vpack.c.bf16 %v1224_v63, %v1223_v62 }
 0xbfa   :  { %2469 = vmatpush1.bf16.msra.mxu0 %v2468_v6  ;;  %v929_v6 = vld [vmem:[%s3592_s4 + $0x110] sm:$0xff] }
 0xbfb   :  { %2471 = vmatprep.subr.bf16.mxu0 %v2470_v8  ;;  %v934_v8 = vld [vmem:[%s3592_s4 + $0x138] sm:$0xff] }
 0xbfc   :  { %v2496_v18 = vpack.c.bf16 %v934_v8, %v929_v6  ;;  %v1276_v6 = vld [vmem:[%s3594_s6 + $0x1c8] sm:$0xff]  ;;  %v2556_v8 = vpack.c.bf16 %v1258_v3, %v1257_v2  ;;  %v1287_v2 = vld [vmem:[%s3594_s6 + $0x220] sm:$0xff] }
 0xbfd   :  { %v1288_v3 = vld [vmem:[%s3594_s6 + $0x228] sm:$0xff] }
 0xbfe   :  { %2473 = vmatpush1.bf16.msra.mxu0 %v2472_v15  ;;  %v1243_v15 = vld [vmem:[%s3594_s6 + $0xc0] sm:$0xff] }
 0xbff   :  { %2475 = vmatprep.subr.bf16.mxu0 %v2474_v17  ;;  %v1244_v17 = vld [vmem:[%s3594_s6 + $0xc8] sm:$0xff] }
 0xc02   :  { %2477 = vmatpush1.bf16.msra.mxu0 %v2476_v26  ;;  %v2526_v26 = vpack.c.bf16 %v1244_v17, %v1243_v15  ;;  %v1278_v15 = vld [vmem:[%s3594_s6 + $0x1d8] sm:$0xff] }
 0xc03   :  { %2479 = vmatprep.subr.bf16.mxu0 %v2478_v27  ;;  %v1227_v27 = vld [vmem:[%s3594_s6 + $0x40] sm:$0xff] }
 0xc04   :  { %v2528_v34 = vpack.c.bf16 %v1228_v28, %v1227_v27  ;;  %v2564_v27 = vpack.c.bf16 %v1262_v21, %v1261_v20  ;;  %v1295_v20 = vld [vmem:[%s3594_s6 + $0x260] sm:$0xff]  ;;  %v1296_v21 = vld [vmem:[%s3594_s6 + $0x268] sm:$0xff] }
 0xc06   :  { %2481 = vmatpush1.bf16.msra.mxu0 %v2480_v30  ;;  %v1246_v30 = vld [vmem:[%s3594_s6 + $0xd8] sm:$0xff] }
 0xc07   :  { %2483 = vmatprep.subr.bf16.mxu0 %v2482_v41  ;;  %v2530_v35 = vpack.c.bf16 %v1246_v30, %v1245_v29  ;;  %v959_v41 = vld [vmem:[%s3592_s4 + $0x200] sm:$0xff]  ;;  %v1264_v30 = vld [vmem:[%s3594_s6 + $0x168] sm:$0xff] }
 0xc08   :  { %v1263_v29 = vld [vmem:[%s3594_s6 + $0x160] sm:$0xff] }
 0xc0a   :  { %2485 = vmatpush1.bf16.msra.mxu0 %v2484_v42  ;;  %v964_v42 = vld [vmem:[%s3592_s4 + $0x228] sm:$0xff] }
 0xc0b   :  { %2511 = vmatprep.subr.bf16.mxu0 %v2510_v45  ;;  %v1231_v45 = vld [vmem:[%s3594_s6 + $0x60] sm:$0xff]  ;;  %v2505_v47 = vpack.c.bf16 %v964_v42, %v959_v41  ;;  %v1266_v41 = vld [vmem:[%s3594_s6 + $0x178] sm:$0xff]  ;;  %v2570_v42 = vpack.c.bf16 %v1282_v39, %v1281_v37 }
 0xcc0   :  { %v890_v49 = vpop.f32.mrb[8].mxu0 }
 0xcc1   :  { %v891_v52 = vadd.f32 %v1562_v46, %v890_v49  ;;  %v2135_v53 = vpop.f32.mrb[9].mxu0  ;;  %v1232_v46 = vld [vmem:[%s3594_s6 + $0x68] sm:$0xff]  ;;  %v974_v49 = vld [vmem:[%s3592_s4 + $0x278] sm:$0xff] }
 0xcc2   :  { %v2536_v50 = vpack.c.bf16 %v1232_v46, %v1231_v45  ;;  %v2508_v53 = vpack.c.bf16 %v974_v49, %v969_v48  ;;  %v975_v48 = vld [vmem:[%s3593_s5] sm:$0x1f] }
 0xcc3   :  { %v3279_v56 = vmax.f32 %v891_v52, 0.0  ;;  %v1268_v52 = vld [vmem:[%s3594_s6 + $0x188] sm:$0xff] }
 0xcc4   :  { %v2542_v54 = vpack.c.bf16 %v1268_v52, %v1267_v51 }
 0xcc5   :  { %1067 = vmatmul.mubr.f32.vlgmr.msra.gmra.mrb[8].mxu1 %v3279_v56  ;;  %1138 = vmatmul.mubr.f32.vlgmr.msra.gmra.mrb[10].mxu0 %v3279_v56 }
 0xcc6   :  { %2488 = vmatpush3.bf16.msra.mxu1 %v2487_v24  ;;  %2168 = vmatprep.mubr.msk.f32.mxu1 %vm2754_vm0, %v2755_v1  ;;  %v1252_v24 = vld [vmem:[%s3594_s6 + $0x108] sm:$0xff] }
 0xcc7   :  { %2489 = vmatprep.subr.bf16.mxu1 %v2753_v0  ;;  %2513 = vmatpush3.bf16.msra.mxu0 %v2512_v10  ;;  %v2544_v10 = vpack.c.bf16 %v1252_v24, %v1251_v55 }
 0xcc8   :  { %2515 = vmatprep.subr.bf16.mxu0 %v2514_v13  ;;  %v2546_v13 = vpack.c.bf16 %v1270_v7, %v1269_v5 }
 0xcca   :  { %2491 = vmatpush3.bf16.msra.mxu1 %v2490_v22  ;;  %v2548_v22 = vpack.c.bf16 %v1254_v57, %v1253_v16  ;;  %v1283_v16 = vld [vmem:[%s3594_s6 + $0x200] sm:$0xff]  ;;  %v1284_v57 = vld [vmem:[%s3594_s6 + $0x208] sm:$0xff] }
 0xccb   :  { %2492 = vmatprep.subr.bf16.mxu1 %v2753_v0  ;;  %2517 = vmatpush3.bf16.msra.mxu0 %v2516_v60  ;;  %v1256_v60 = vld [vmem:[%s3594_s6 + $0x128] sm:$0xff] }
 0xccc   :  { %2519 = vmatprep.subr.bf16.mxu0 %v2518_v61  ;;  %v1273_v61 = vld [vmem:[%s3594_s6 + $0x1b0] sm:$0xff]  ;;  %v2552_v62 = vpack.c.bf16 %v1256_v60, %v1255_v59  ;;  %v2575_v59 = vpack.c.bf16 %v1284_v57, %v1283_v16 }
 0xcce   :  { %2494 = vmatpush3.bf16.msra.mxu1 %v2493_v4  ;;  %v1275_v4 = vld [vmem:[%s3594_s6 + $0x1c0] sm:$0xff] }
 0xccf   :  { %2495 = vmatprep.subr.bf16.mxu1 %v2753_v0  ;;  %2521 = vmatpush3.bf16.msra.mxu0 %v2520_v9  ;;  %v2558_v9 = vpack.c.bf16 %v1276_v6, %v1275_v4  ;;  %v2581_v4 = vpack.c.bf16 %v1288_v3, %v1287_v2  ;;  %v1289_v6 = vld [vmem:[%s3594_s6 + $0x230] sm:$0xff] }
 0xcd0   :  { %2523 = vmatprep.subr.bf16.mxu0 %v2522_v11  ;;  %v1259_v11 = vld [vmem:[%s3594_s6 + $0x140] sm:$0xff] }
 0xcd1   :  { %v2560_v17 = vpack.c.bf16 %v1260_v12, %v1259_v11  ;;  %v1292_v11 = vld [vmem:[%s3594_s6 + $0x248] sm:$0xff] }
 0xcd2   :  { %2497 = vmatpush3.bf16.msra.mxu1 %v2496_v18  ;;  %v2562_v18 = vpack.c.bf16 %v1278_v15, %v1277_v14  ;;  %v1293_v14 = vld [vmem:[%s3594_s6 + $0x250] sm:$0xff]  ;;  %v1294_v15 = vld [vmem:[%s3594_s6 + $0x258] sm:$0xff] }
 0xcd3   :  { %2498 = vmatprep.subr.bf16.mxu1 %v2753_v0  ;;  %2525 = vmatpush3.bf16.msra.mxu0 %v2524_v23  ;;  %v1279_v23 = vld [vmem:[%s3594_s6 + $0x1e0] sm:$0xff] }
 0xcd4   :  { %2527 = vmatprep.subr.bf16.mxu0 %v2526_v26  ;;  %v1280_v26 = vld [vmem:[%s3594_s6 + $0x1e8] sm:$0xff] }
 0xcd5   :  { %v2566_v28 = vpack.c.bf16 %v1280_v26, %v1279_v23  ;;  %v2593_v23 = vpack.c.bf16 %v1296_v21, %v1295_v20 }
 0xcd6   :  { %2500 = vmatpush3.bf16.msra.mxu1 %v2499_v31  ;;  %v2568_v31 = vpack.c.bf16 %v1264_v30, %v1263_v29 }
 0xcd7   :  { %2501 = vmatprep.subr.bf16.mxu1 %v2753_v0  ;;  %2529 = vmatpush3.bf16.msra.mxu0 %v2528_v34  ;;  %v2538_v34 = vpack.c.bf16 %v1250_v33, %v1249_v32 }
 0xcd8   :  { %2531 = vmatprep.subr.bf16.mxu0 %v2530_v35  ;;  %v1233_v35 = vld [vmem:[%s3594_s6 + $0x70] sm:$0xff] }
 0xcd9   :  { %v2540_v38 = vpack.c.bf16 %v1234_v36, %v1233_v35  ;;  %v1563_v36 = vld [vmem:[%s3595_s7] ss:$0 sm:$0xff] }
 0xcda   :  { %2503 = vmatpush3.bf16.msra.mxu1 %v2502_v40  ;;  %v1265_v40 = vld [vmem:[%s3594_s6 + $0x170] sm:$0xff] }
 0xcdb   :  { %2504 = vmatprep.subr.bf16.mxu1 %v2753_v0  ;;  %2533 = vmatpush3.bf16.msra.mxu0 %v2532_v43  ;;  %v2572_v43 = vpack.c.bf16 %v1266_v41, %v1265_v40 }
 0xcdc   :  { %2535 = vmatprep.subr.bf16.mxu0 %v2534_v44  ;;  %v977_v44 = vlaneseq }
 0xcde   :  { %2506 = vmatpush3.bf16.msra.mxu1 %v2505_v47  ;;  %v978_v45 = vshrl.u32 %v977_v44, 7 }
 0xcdf   :  { %2507 = vmatprep.subr.bf16.mxu1 %v2753_v0  ;;  %2537 = vmatpush3.bf16.msra.mxu0 %v2536_v50 }
 0xce0   :  { %2539 = vmatprep.subr.bf16.mxu0 %v2538_v34  ;;  %v979_v46 = vsub.s32 0, %v978_v45  ;;  %v987_v47 = vsub.s32 2, %v978_v45  ;;  %v983_v49 = vsub.s32 1, %v978_v45  ;;  %v991_v50 = vsub.s32 3, %v978_v45 }
 0xce2   :  { %2509 = vmatpush3.bf16.msra.mxu1 %v2508_v53  ;;  %v980_v51 = vrot.slane %v975_v48, %v979_v46  ;;  %v988_v52 = vrot.slane %v975_v48, %v987_v47  ;;  %v984_v53 = vrot.slane %v975_v48, %v983_v49 }
 0xce3   :  { %2543 = vmatprep.subr.bf16.mxu1 %v2542_v54  ;;  %2541 = vmatpush3.bf16.msra.mxu0 %v2540_v38  ;;  %v992_v54 = vrot.slane %v975_v48, %v991_v50 }
 0xce4   :  { %2574 = vmatprep.subr.bf16.mxu0 %v2753_v0 }
 0xce5   :  { %2169 = vmatmul.mubr.f32.vlgmr.msra.gmra.mrb[10].mxu1 %v3279_v56  ;;  %v1274_v56 = vld [vmem:[%s3594_s6 + $0x1b8] sm:$0xff] }
 0xce6   :  { %2545 = vmatpush3.bf16.msra.mxu1 %v2544_v10  ;;  %v2554_v63 = vpack.c.bf16 %v1274_v56, %v1273_v61  ;;  %v1285_v56 = vld [vmem:[%s3594_s6 + $0x210] sm:$0xff] }
 0xce7   :  { %2547 = vmatprep.subr.bf16.mxu1 %v2546_v13 }
 0xcea   :  { %2549 = vmatpush3.bf16.msra.mxu1 %v2548_v22 }
 0xceb   :  { %2551 = vmatprep.subr.bf16.mxu1 %v2550_v25 }
 0xcee   :  { %2553 = vmatpush3.bf16.msra.mxu1 %v2552_v62  ;;  %v1286_v62 = vld [vmem:[%s3594_s6 + $0x218] sm:$0xff] }
 0xcef   :  { %2555 = vmatprep.subr.bf16.mxu1 %v2554_v63  ;;  %v2578_v63 = vpack.c.bf16 %v1286_v62, %v1285_v56 }
 0xcf2   :  { %2557 = vmatpush3.bf16.msra.mxu1 %v2556_v8 }
 0xcf3   :  { %2559 = vmatprep.subr.bf16.mxu1 %v2558_v9  ;;  %v1291_v9 = vld [vmem:[%s3594_s6 + $0x240] sm:$0xff] }
 0xcf4   :  { %v2587_v12 = vpack.c.bf16 %v1292_v11, %v1291_v9 }
 0xcf6   :  { %2561 = vmatpush3.bf16.msra.mxu1 %v2560_v17  ;;  %v2590_v17 = vpack.c.bf16 %v1294_v15, %v1293_v14 }
 0xcf7   :  { %2563 = vmatprep.subr.bf16.mxu1 %v2562_v18  ;;  %v995_v18 = vsub.s32 4, %v978_v45 }
 0xcf9   :  { %v996_v26 = vrot.slane %v975_v48, %v995_v18 }
 0xcfa   :  { %2565 = vmatpush3.bf16.msra.mxu1 %v2564_v27  ;;  %v1297_v27 = vld [vmem:[%s3594_s6 + $0x270] sm:$0xff] }
 0xcfb   :  { %2567 = vmatprep.subr.bf16.mxu1 %v2566_v28  ;;  %v1298_v28 = vld [vmem:[%s3594_s6 + $0x278] sm:$0xff] }
 0xcfc   :  { %v2596_v30 = vpack.c.bf16 %v1298_v28, %v1297_v27 }
 0xcfe   :  { %2569 = vmatpush3.bf16.msra.mxu1 %v2568_v31 }
 0xcff   :  { %2571 = vmatprep.subr.bf16.mxu1 %v2570_v42 }
 0xd02   :  { %2573 = vmatpush3.bf16.msra.mxu1 %v2572_v43 }
 0xd98   :  { %v1068_v55 = vpop.f32.mrb[8].mxu1  ;;  %v1139_v24 = vpop.f32.mrb[10].mxu0 }
 0xd99   :  { %v1069_v5 = vadd.f32 %v1068_v55, %v980_v51  ;;  %v1140_v7 = vadd.f32 %v1139_v24, %v988_v52  ;;  %v1070_v10 = vpop.f32.mrb[9].mxu1  ;;  %v1141_v13 = vpop.f32.mrb[11].mxu0 }
 0xd9a   :  { %v1071_v19 = vadd.f32 %v1070_v10, %v984_v53  ;;  %v1142_v58 = vadd.f32 %v1141_v13, %v992_v54 }
 0xd9b   :  { %v1214_v60 = vmax.f32 %v1069_v5, 0.0  ;;  %v1216_v61 = vmax.f32 %v1140_v7, 0.0 }
 0xd9c   :  { %v1215_v22 = vmax.f32 %v1071_v19, 0.0  ;;  %v1217_v25 = vmax.f32 %v1142_v58, 0.0 }
 0xd9e   :  { %1370 = vmatprep.mubr.f32.mxu0 %v1215_v22  ;;  %1440 = vmatprep.mubr.f32.mxu1 %v1217_v25 }
 0xd9f   :  { %1371 = vmatmul.mubr.f32.vlgmr.msra.gmra.mrb[12].mxu0 %v1214_v60  ;;  %1441 = vmatmul.mubr.f32.vlgmr.msra.gmra.mrb[12].mxu1 %v1216_v61 }
 0xda0   :  { %2576 = vmatpush3.bf16.msra.mxu0 %v2575_v59  ;;  %2203 = vmatprep.mubr.msk.f32.mxu0 %vm2754_vm0, %v2755_v1  ;;  %v1290_v1 = vld [vmem:[%s3594_s6 + $0x238] sm:$0xff]  ;;  %s2759_s6 = smov [#allocation7]  }
 0xda1   :  { %2577 = vmatprep.subr.bf16.mxu0 %v2753_v0  ;;  %v2584_v8 = vpack.c.bf16 %v1290_v1, %v1289_v6  ;;  %s1537_s7 = sshll.u32 %s2759_s6, 4  ;;  %s1538_s7 = int_to_ptr.vmem [resolvable:$true] %s1537_s7 }
 0xda2   :  { %s2721_s14 = scalar_lea.vmem %s1538_s7, 32  ;;  %p2726_p3 = scmp.lt.s32.totalorder %s1538_s7, %s1538_s7 }
 0xda3   :  { %p2722_p2 = scmp.ne.s32.totalorder %s1538_s7, %s2721_s14  ;;  %p2727_p4 = scmp.lt.s32.totalorder %s2721_s14, %s2721_s14 }
 0xda4   :  { %2579 = vmatpush3.bf16.msra.mxu0 %v2578_v63 }
 0xda5   :  { %2580 = vmatprep.subr.bf16.mxu0 %v2753_v0  ;;  %p2728_p5 = por %p2727_p4, %p2726_p3 }
 0xda7   :  { %p2729_p6 = pnand %p2728_p5, %p2722_p2 }
 0xda8   :  { %2582 = vmatpush3.bf16.msra.mxu0 %v2581_v4 }
 0xda9   :  { %2583 = vmatprep.subr.bf16.mxu0 %v2753_v0 }
 0xdac   :  { %2585 = vmatpush3.bf16.msra.mxu0 %v2584_v8 }
 0xdad   :  { %2586 = vmatprep.subr.bf16.mxu0 %v2753_v0 }
 0xdb0   :  { %2588 = vmatpush3.bf16.msra.mxu0 %v2587_v12 }
 0xdb1   :  { %2589 = vmatprep.subr.bf16.mxu0 %v2753_v0 }
 0xdb4   :  { %2591 = vmatpush3.bf16.msra.mxu0 %v2590_v17 }
 0xdb5   :  { %2592 = vmatprep.subr.bf16.mxu0 %v2753_v0 }
 0xdb8   :  { %v1210_v29 = vpop.f32.mrb[10].mxu1  ;;  %2594 = vmatpush3.bf16.msra.mxu0 %v2593_v23 }
 0xdb9   :  { %v1211_v31 = vadd.f32 %v1210_v29, %v996_v26  ;;  %v2170_v32 = vpop.f32.mrb[11].mxu1  ;;  %2595 = vmatprep.subr.bf16.mxu0 %v2753_v0 }
 0xdbb   :  { %v1218_v33 = vmax.f32 %v1211_v31, 0.0 }
 0xdbc   :  { %2597 = vmatpush3.bf16.msra.mxu0 %v2596_v30 }
 0xdbf   :  { %2204 = vmatmul.mubr.f32.vlgmr.msra.gmra.mrb[14].mxu0 %v1218_v33 }
 0xe72   :  { %v1766_v34 = vpop.f32.mrb[12].mxu0  ;;  %v1801_v35 = vpop.f32.mrb[12].mxu1 }
 0xe73   :  { %v1767_v37 = vpop.f32.mrb[13].mxu0  ;;  %v1802_v38 = vpop.f32.mrb[13].mxu1 }
 0xe74   :  { %v1768_v39 = vadd.f32 %v1767_v37, %v1766_v34  ;;  %v1803_v40 = vadd.f32 %v1802_v38, %v1801_v35 }
 0xe76   :  { %v1373_v41 = vadd.f32 %v1768_v39, %v1563_v36 }
 0xe78   :  { %v1443_v42 = vadd.f32 %v1803_v40, %v1373_v41 }
 0xe92   :  { %v1512_v43 = vpop.f32.mrb[14].mxu0 }
 0xe93   :  { %v1513_v44 = vadd.f32 %v1512_v43, %v1443_v42  ;;  %v2205_v45 = vpop.f32.mrb[15].mxu0 }
 0xe95   :  { %v1516_v0 = vmax.f32 %v1513_v44, 0.0 }
 0xe97   :  { %v1518_v46 = vsel %vm1517_vm1, %v1516_v0, -inf }
 0xe98   :  { %1519 = vmax.xlane.f32.xlu0 %v1518_v46 }
 0xf25   :  { %v1520_v47 = vpop.xlane.xlu0 %1519 }
 0xf26   :  { %v1521_v48 = vsub.f32 %v1516_v0, %v1520_v47 }
 0xf28   :  { %v1522_v49 = vmul.f32 1.442695, %v1521_v48 }
 0xf2a   :  { %2673 = vpow2.f32 %v1522_v49 }
 0xf34   :  { %v2674_v50 = vpop.eup %2673 }
 0xf35   :  { %v1524_v51 = vsel %vm1517_vm1, %v2674_v50, 0.0 }
 0xf36   :  { %1525 = vadd.xlane.f32.xlu1 %v1524_v51 }
 0xfc3   :  { %v1526_v52 = vpop.xlane.xlu1 %1525 }
 0xfc4   :  { %2675 = vlog2.f32 %v1526_v52 }
 0xfce   :  { %v2676_v53 = vpop.eup %2675 }
 0xfcf   :  { %v1528_v54 = vmul.f32 0.6931472, %v2676_v53 }
 0xfd1   :  { %v1529_v55 = vsub.f32 %v1521_v48, %v1528_v54 }
 0xfd3   :  { %1530 = vst.msk [vmem:[#allocation7] sm:$0x3] %vm1517_vm1, %v1529_v55 }
 0xfd4   :  { %2732 = shalt.err (!%p2729_p6)
}
 0xfd5   :  { %s2733_s17 = scalar_lea.hbm %s3596_s8, 32 }
 0xfd6   :  { %p2734_p7 = scmp.ne.s32.totalorder %s3596_s8, %s2733_s17  ;;  %p2737_p8 = scmp.lt.u32.totalorder %s2733_s17, %s3596_s8 }
 0xfd8   :  { %p2739_p9 = pnand %p2737_p8, %p2734_p7 }
 0xfda   :  { %2742 = shalt.err (!%p2739_p9)
}
 0xfdb   :  { %1540 = dma.vmem_to_hbm [thread:$0]  %s1538_s7, 32, %s3596_s8, [#allocation4]  }
 0xfdc   :  { %2747 = dma.done.wait [#allocation4], 32  }
 0xfdd   :  { %2748 = vsyncadd [#allocation4], 4294967264 }
 0xfde   :  { %1544 = vsyncpa [#allocation3], 1 }
 0xfdf   :  { %1545 = vsyncpa [#allocation6], 1 }
 0xfe0   :  { %1546 = vsyncpa [#allocation4], 1 }

</bundles_post_ra>
